<compile_context>
chip_gen: v7x
topology: tpu7x:2x2x1
jax: 0.10.0
libtpu: 0.0.40
codegen_flags: <defaults>
</compile_context>

<pallas_src>
import math
from functools import partial

import numpy as np

import jax
import jax.numpy as jnp
from jax.experimental import pallas as pl
from jax.experimental.pallas import tpu as pltpu

_INV_SQRT_2PI = 1.0 / math.sqrt(2.0 * math.pi)
_TWO_PI = 2.0 * math.pi


def _round_up(x: int, m: int) -> int:
    return ((x + m - 1) // m) * m


def _cdiv(a: int, b: int) -> int:
    return (a + b - 1) // b


def _tpu_caps():
    """(physical VMEM bytes per core, is_v5e). Conservative fallbacks."""
    vmem_cap = 64 << 20                      # v7x-safe default
    try:
        vmem_cap = int(pltpu.get_tpu_info().vmem_capacity_bytes)
    except Exception:
        pass
    kind = ""
    try:
        kind = jax.devices()[0].device_kind.lower()
    except Exception:
        pass
    is_v5e = any(t in kind for t in ("v5 lite", "v5e", "v5lite"))
    return vmem_cap, is_v5e


# ----------------------------------------------------------------------------
# Kernels
# ----------------------------------------------------------------------------
def _envelope_only_kernel(sig_ref, a_ref, b_ref, t_ref, out_ref, *, env_factor):
    """Gaussian-envelope multiply only (shifts is None): pure elementwise."""
    t = t_ref[...]                                        # (1, Np)
    mean = a_ref[...]                                     # (TR, 1)
    std = (jnp.abs(b_ref[...]) + 1e-12) * env_factor      # (TR, 1)
    inv_std = 1.0 / std                                   # tiny per-row divide
    amp = inv_std * _INV_SQRT_2PI
    inv_two_var = 0.5 * inv_std * inv_std
    d = t - mean                                          # (TR, Np)
    env = amp * jnp.exp(-(d * d) * inv_two_var)
    out_ref[...] = (sig_ref[...] * env).astype(out_ref.dtype)


def _envelope_shift_kernel(sig_ref, a_ref, b_ref, shift_ref, t_ref, klocal_ref,
                           cf_ref, sf_ref, ci_ref, si_ref, out_ref,
                           pos_ref, acc_ref, *,
                           env_factor, n_samples, n_coeffs, tk):
    """Envelope multiply + fft_shift via real-DFT matmuls, K-tiled on axis 1."""
    ki = pl.program_id(1)
    nk = pl.num_programs(1)

    @pl.when(ki == 0)
    def _init():
        t = t_ref[...]
        mean = a_ref[...]
        std = (jnp.abs(b_ref[...]) + 1e-12) * env_factor
        inv_std = 1.0 / std
        amp = inv_std * _INV_SQRT_2PI
        inv_two_var = 0.5 * inv_std * inv_std
        d = t - mean
        env = amp * jnp.exp(-(d * d) * inv_two_var)
        pos_ref[...] = (sig_ref[...] * env).astype(pos_ref.dtype)
        acc_ref[...] = jnp.zeros_like(acc_ref)

    pos = pos_ref[...]                                    # (TR, Np) bf16

    # Forward real DFT (ortho): A_k = Re X_k, B_k = -Im X_k (this spectral tile).
    A = jnp.dot(pos, cf_ref[...], preferred_element_type=jnp.float32)   # (TR, TK)
    B = jnp.dot(pos, sf_ref[...], preferred_element_type=jnp.float32)   # (TR, TK)

    # Phase exp(-i * 2*pi * k * shift * n_samples / n_coeffs), k = ki*TK + k_local.
    alpha = shift_ref[...] * (float(n_samples) / float(n_coeffs))       # (TR, 1)
    alpha = alpha - jnp.floor(alpha)                                    # k integer -> mod 1
    # Two-stage reduction of the tile offset keeps f32 error ~ max(TK, nK)*2^-24.
    f1 = alpha * float(tk)
    f1 = f1 - jnp.floor(f1)                                             # frac(TK*alpha)
    off = ki.astype(jnp.float32) * f1
    off = off - jnp.floor(off)                                          # frac(k_start*alpha)
    u = klocal_ref[...] * alpha + off                                   # (TR, TK) cycles
    u = u - jnp.floor(u + 0.5)                                          # wrap to [-0.5, 0.5)
    phi = _TWO_PI * u
    c = jnp.cos(phi)
    s = jnp.sin(phi)
    new_re = A * c - B * s                                              # Re X'_k
    new_im_neg = A * s + B * c                                          # -Im X'_k

    # Inverse real DFT (ortho), accumulated over spectral tiles. Two separate
    # accumulated dots -> no (TR, 2*TK) concatenate copy.
    acc_ref[...] += jnp.dot(new_re.astype(ci_ref.dtype), ci_ref[...],
                            preferred_element_type=jnp.float32)
    acc_ref[...] += jnp.dot(new_im_neg.astype(si_ref.dtype), si_ref[...],
                            preferred_element_type=jnp.float32)

    @pl.when(ki == nk - 1)
    def _store():
        out_ref[...] = acc_ref[...].astype(out_ref.dtype)


# ----------------------------------------------------------------------------
# VMEM budgets (double-buffering accounted per spec)
# ----------------------------------------------------------------------------
def _shift_vmem_bytes(tr, tk, np_pad, dft_bytes, mat_buffers):
    b = 0
    b += 2 * tr * np_pad * 4                           # signal blocks
    b += 2 * tr * np_pad * 4                           # output blocks
    b += 2 * 3 * tr * 128 * 4                          # a / b / shift (lane-padded)
    b += 2 * 8 * np_pad * 4                            # time row
    b += 2 * 8 * tk * 4                                # local-k row
    b += mat_buffers * 4 * np_pad * tk * dft_bytes     # cf, sf, ci, si
    b += tr * np_pad * dft_bytes                       # positioned scratch
    b += tr * np_pad * 4                               # irfft accumulator scratch
    b += 8 * tr * tk * 4 + 4 * tr * np_pad * 4         # live intermediates (rough)
    return b


def _env_vmem_bytes(tr, np_pad):
    return (4 * tr * np_pad * 4 + 2 * 2 * tr * 128 * 4 + 2 * 8 * np_pad * 4
            + 3 * tr * np_pad * 4)


# ----------------------------------------------------------------------------
# Module
# ----------------------------------------------------------------------------
class EnvelopeAndPosition:
    """JAX/Pallas port of modules/reds.py::EnvelopeAndPosition (Gaussian path)."""

    def __init__(self, n_samples: int, envelope_type: str = "Gaussian",
                 dft_dtype=jnp.bfloat16, _force_spectral_tile=None):
        assert n_samples % 2 == 0, "even n_samples required for the rfft/irfft round trip"
        self.n_samples = n_samples
        self.envelope_type = envelope_type
        self.gamma_ramp_size = 128
        self.gamma_ramp_exponent = 2
        self.gaussian_envelope_factor = 0.1
        self.dft_dtype = dft_dtype
        self.dft_bytes = jnp.dtype(dft_dtype).itemsize
        self._force_tk = _force_spectral_tile            # test knob: force K-tiling

        N = n_samples
        Np = _round_up(N, 128)                           # lane-dense time axis
        K = N // 2 + 1
        Kp = _round_up(K, 128)                           # lane-dense spectral axis
        self.np_pad = Np
        self.n_coeffs = K
        self.kp_pad = Kp

        # Real-DFT matrices (ortho norm), built on the TRUE N angles; padded
        # rows/cols are zero so padding never changes the math.
        t = np.arange(N, dtype=np.float64)[:, None]
        k = np.arange(K, dtype=np.float64)[None, :]
        ang = 2.0 * np.pi * t * k / N                    # (N, K)
        scale = 1.0 / math.sqrt(N)

        cf = np.zeros((Np, Kp), np.float64)
        sf = np.zeros((Np, Kp), np.float64)
        cf[:N, :K] = np.cos(ang) * scale
        sf[:N, :K] = np.sin(ang) * scale

        w = np.full((K, 1), 2.0)
        w[0, 0] = 1.0
        w[-1, 0] = 1.0                                   # Nyquist (N even)
        ci = np.zeros((Kp, Np), np.float64)
        si = np.zeros((Kp, Np), np.float64)
        ci[:K, :N] = np.cos(ang).T * scale * w
        si[:K, :N] = np.sin(ang).T * scale * w

        self.cf = jnp.asarray(cf, dft_dtype)
        self.sf = jnp.asarray(sf, dft_dtype)
        self.ci = jnp.asarray(ci, dft_dtype)
        self.si = jnp.asarray(si, dft_dtype)

        t_row = np.full((1, Np), 1.0, np.float64)
        t_row[0, :N] = np.linspace(0.0, 1.0, N)
        self.t_row = jnp.asarray(t_row, jnp.float32)

        self.vmem_cap, self.is_v5e = _tpu_caps()
        # v5e MXU is 128-wide: 128 rows already fill it; v6e/v7x have 256-wide MXUs.
        self.tr_cap = 128 if self.is_v5e else 256

    # ---- tile selection ------------------------------------------------------
    def _row_tile(self, R, cap):
        tr = min(cap, _round_up(max(R, 1), 8))
        if tr > 8 and _cdiv(R, tr) < 2:
            # >= 2 row steps: lets megacore split the parallel axis and enables
            # input/output pipelining.
            tr = max(8, _round_up(_cdiv(tr, 2), 8))
        return tr

    def _select_shift_config(self, R):
        Np, Kp, dftb = self.np_pad, self.kp_pad, self.dft_bytes
        budget = int(0.85 * self.vmem_cap)
        tr0 = self._row_tile(R, self.tr_cap)
        tr_cands = sorted({t for t in (tr0, 256, 128, 64, 32, 16, 8) if t <= tr0},
                          reverse=True)
        tk_stream = [tk for tk in range(512, 0, -128) if Kp % tk == 0 and tk < Kp]

        if self._force_tk is not None:
            tk = self._force_tk
            assert tk % 128 == 0 and Kp % tk == 0
            resident = tk >= Kp
            for t in tr_cands:
                if _shift_vmem_bytes(t, tk, Np, dftb, 1 if resident else 2) <= budget:
                    return t, tk, resident
            return tr_cands[-1], tk, resident

        for t in tr_cands:
            # Whole spectral width resident (constant index map, single-buffered).
            if _shift_vmem_bytes(t, Kp, Np, dftb, 1) <= budget:
                return t, Kp, True
            # Stream spectral tiles (double-buffered) over the inner grid axis.
            for tk in tk_stream:
                if _shift_vmem_bytes(t, tk, Np, dftb, 2) <= budget:
                    return t, tk, False
        # Nothing fits the comfort budget: smallest config, clamped vmem limit.
        return tr_cands[-1], (tk_stream[-1] if tk_stream else Kp), (not tk_stream)

    def _vmem_limit(self, needed):
        return min(max(int(needed * 1.3), 32 << 20), int(0.9 * self.vmem_cap))

    # ---- no-shift path -------------------------------------------------------
    def _run_envelope_only(self, sig2d, a2d, b2d, R):
        Np = self.np_pad
        budget = int(0.85 * self.vmem_cap)
        tr = self._row_tile(R, 512)                     # mem-bound: big row tile
        while tr > 8 and _env_vmem_bytes(tr, Np) > budget:
            tr = max(8, _round_up(_cdiv(tr, 2), 8))
        Rp = _round_up(R, tr)
        pad = Rp - R
        if pad:
            sig2d = jnp.pad(sig2d, ((0, pad), (0, 0)))
            a2d = jnp.pad(a2d, ((0, pad), (0, 0)), constant_values=0.5)
            b2d = jnp.pad(b2d, ((0, pad), (0, 0)), constant_values=1.0)

        return pl.pallas_call(
            partial(_envelope_only_kernel, env_factor=self.gaussian_envelope_factor),
            out_shape=jax.ShapeDtypeStruct((Rp, Np), jnp.float32),
            grid_spec=pltpu.PrefetchScalarGridSpec(
                num_scalar_prefetch=0,
                grid=(Rp // tr,),
                in_specs=[
                    pl.BlockSpec((tr, Np), lambda i: (i, 0)),   # signals
                    pl.BlockSpec((tr, 1), lambda i: (i, 0)),    # a (means)
                    pl.BlockSpec((tr, 1), lambda i: (i, 0)),    # b (widths)
                    pl.BlockSpec((1, Np), lambda i: (0, 0)),    # time row
                ],
                out_specs=pl.BlockSpec((tr, Np), lambda i: (i, 0)),
            ),
            compiler_params=pltpu.CompilerParams(
                dimension_semantics=("parallel",),
                vmem_limit_bytes=self._vmem_limit(_env_vmem_bytes(tr, Np))),
            cost_estimate=pl.CostEstimate(
                flops=6 * Rp * Np,
                transcendentals=Rp * Np,
                bytes_accessed=2 * Rp * Np * 4),
        )(sig2d, a2d, b2d, self.t_row)

    # ---- shift path ----------------------------------------------------------
    def _run_envelope_shift(self, sig2d, a2d, b2d, shift2d, R):
        N, Np, K, Kp = self.n_samples, self.np_pad, self.n_coeffs, self.kp_pad
        dftb = self.dft_bytes
        tr, tk, resident = self._select_shift_config(R)
        nk = Kp // tk

        Rp = _round_up(R, tr)
        pad = Rp - R
        if pad:
            sig2d = jnp.pad(sig2d, ((0, pad), (0, 0)))
            a2d = jnp.pad(a2d, ((0, pad), (0, 0)), constant_values=0.5)
            b2d = jnp.pad(b2d, ((0, pad), (0, 0)), constant_values=1.0)
            shift2d = jnp.pad(shift2d, ((0, pad), (0, 0)))

        k_local = jnp.asarray(np.arange(tk, dtype=np.float64)[None, :], jnp.float32)

        mat_buffers = 1 if resident else 2
        vmem_limit = self._vmem_limit(_shift_vmem_bytes(tr, tk, Np, dftb, mat_buffers))

        def mat_spec(shape, index_map):
            if resident:
                # Constant index map -> a second pipeline buffer is pure waste.
                return pl.BlockSpec(shape, index_map, pipeline_mode=pl.Buffered(1))
            return pl.BlockSpec(shape, index_map)

        n_row_tiles = Rp // tr
        matrix_bytes = 4 * Np * Kp * dftb * (1 if resident else n_row_tiles)
        cost = pl.CostEstimate(
            flops=8 * Rp * Np * Kp,
            transcendentals=Rp * Np + 2 * Rp * Kp,
            bytes_accessed=2 * Rp * Np * 4 + matrix_bytes)

        return pl.pallas_call(
            partial(_envelope_shift_kernel,
                    env_factor=self.gaussian_envelope_factor,
                    n_samples=N, n_coeffs=K, tk=tk),
            out_shape=jax.ShapeDtypeStruct((Rp, Np), jnp.float32),
            grid_spec=pltpu.PrefetchScalarGridSpec(
                num_scalar_prefetch=0,
                grid=(n_row_tiles, nk),
                in_specs=[
                    pl.BlockSpec((tr, Np), lambda i, k: (i, 0)),   # signals
                    pl.BlockSpec((tr, 1), lambda i, k: (i, 0)),    # a (means)
                    pl.BlockSpec((tr, 1), lambda i, k: (i, 0)),    # b (widths)
                    pl.BlockSpec((tr, 1), lambda i, k: (i, 0)),    # shifts
                    pl.BlockSpec((1, Np), lambda i, k: (0, 0)),    # time row
                    pl.BlockSpec((1, tk), lambda i, k: (0, 0)),    # local k row
                    mat_spec((Np, tk), lambda i, k: (0, k)),       # fwd cos
                    mat_spec((Np, tk), lambda i, k: (0, k)),       # fwd sin
                    mat_spec((tk, Np), lambda i, k: (k, 0)),       # inv cos (weighted)
                    mat_spec((tk, Np), lambda i, k: (k, 0)),       # inv sin (weighted)
                ],
                out_specs=pl.BlockSpec((tr, Np), lambda i, k: (i, 0)),
                scratch_shapes=[
                    pltpu.VMEM((tr, Np), self.dft_dtype),   # positioned signal (bf16)
                    pltpu.VMEM((tr, Np), jnp.float32),      # irfft accumulator
                ],
            ),
            compiler_params=pltpu.CompilerParams(
                dimension_semantics=("parallel", "arbitrary"),
                vmem_limit_bytes=vmem_limit),
            cost_estimate=cost,
        )(sig2d, a2d, b2d, shift2d, self.t_row, k_local,
          self.cf, self.sf, self.ci, self.si)

    # ---- forward -------------------------------------------------------------
    def __call__(self, signals, a, b, adjustment=None, shifts=None):
        if self.envelope_type != "Gaussian":
            # TODO(synk): gamma_pdf body not provided in the reference source.
            raise NotImplementedError("Gamma envelope not implemented")
        if adjustment is not None:
            # TODO(synk): fft_convolve body not provided in the reference source.
            raise NotImplementedError("adjustment / fft_convolve path not implemented")

        batch, n_events, n_samples = signals.shape
        assert n_samples == self.n_samples
        assert a.shape == b.shape == (batch, n_events)

        R = batch * n_events
        N, Np = self.n_samples, self.np_pad

        sig2d = signals.reshape(R, N).astype(jnp.float32)
        if Np != N:
            sig2d = jnp.pad(sig2d, ((0, 0), (0, Np - N)))
        a2d = a.reshape(R, 1).astype(jnp.float32)
        b2d = b.reshape(R, 1).astype(jnp.float32)

        if shifts is None:
            out2d = self._run_envelope_only(sig2d, a2d, b2d, R)
        else:
            shift2d = jnp.reshape(shifts, (R, -1))[:, :1].astype(jnp.float32)
            out2d = self._run_envelope_shift(sig2d, a2d, b2d, shift2d, R)

        return out2d[:R, :N].reshape(batch, n_events, N)


# ----------------------------------------------------------------------------
# Plain-JAX reference (mirrors the PyTorch forward: Gaussian pdf2 + fft_shift)
# ----------------------------------------------------------------------------
def _reference(signals, a, b, shifts, n_samples, env_factor=0.1):
    x = jnp.linspace(0.0, 1.0, n_samples)
    mean = a[..., None]
    std = (jnp.abs(b) + 1e-12)[..., None] * env_factor
    env = (1.0 / (std * jnp.sqrt(2.0 * jnp.pi))) * jnp.exp(
        -((x - mean) ** 2) / (2.0 * std * std))
    positioned = signals * env
    if shifts is None:
        return positioned
    spec = jnp.fft.rfft(positioned, axis=-1, norm="ortho")
    K = spec.shape[-1]
    shift_vec = jnp.arange(K) * 2j * jnp.pi / K
    mult = jnp.exp(-shift_vec * (shifts * n_samples))
    spec = spec * mult
    return jnp.fft.irfft(spec, axis=-1, norm="ortho")[..., :n_samples]


if __name__ == "__main__":
    key = jax.random.PRNGKey(0)
    B, E, N = 2, 16, 256
    k1, k2, k3, k4 = jax.random.split(key, 4)
    signals = jax.random.normal(k1, (B, E, N), jnp.float32)
    a = jax.random.uniform(k2, (B, E), jnp.float32, 0.2, 0.8)        # envelope means
    b = jax.random.uniform(k3, (B, E), jnp.float32, 0.5, 1.5)        # envelope widths
    shifts = jax.random.uniform(k4, (B, E, 1), jnp.float32, -0.25, 0.25)

    module = EnvelopeAndPosition(n_samples=N, envelope_type="Gaussian")

    # Shift path (resident spectral tile, single-buffered DFT matrices).
    out = jax.block_until_ready(module(signals, a, b, adjustment=None, shifts=shifts))
    ref = _reference(signals, a, b, shifts, N,
                     env_factor=module.gaussian_envelope_factor)
    rel = float(jnp.max(jnp.abs(out - ref)) / (jnp.max(jnp.abs(ref)) + 1e-8))
    assert out.shape == (B, E, N)
    assert rel < 2e-2, f"shift-path relative error too large: {rel}"

    # Shift path again with the streamed / K-tiled spectral axis forced on,
    # to exercise the accumulator path used for large n_samples.
    module_kt = EnvelopeAndPosition(n_samples=N, envelope_type="Gaussian",
                                    _force_spectral_tile=128)
    out_kt = jax.block_until_ready(
        module_kt(signals, a, b, adjustment=None, shifts=shifts))
    rel_kt = float(jnp.max(jnp.abs(out_kt - ref)) / (jnp.max(jnp.abs(ref)) + 1e-8))
    assert rel_kt < 2e-2, f"k-tiled shift-path relative error too large: {rel_kt}"

    # No-shift path (dedicated envelope-only kernel, no DFT inputs at all).
    out_ns = jax.block_until_ready(module(signals, a, b, adjustment=None, shifts=None))
    ref_ns = _reference(signals, a, b, None, N,
                        env_factor=module.gaussian_envelope_factor)
    rel_ns = float(jnp.max(jnp.abs(out_ns - ref_ns)) /
                   (jnp.max(jnp.abs(ref_ns)) + 1e-8))
    assert rel_ns < 1e-4, f"no-shift relative error too large: {rel_ns}"

    print("KERNEL_OK")
</pallas_src>

<mosaic_0001>
module attributes {stable_mosaic.version = 11 : i64} {
  func.func @_envelope_shift_kernel(%arg0: i32, %arg1: i32, %arg2: memref<16x256xf32, #tpu.memory_space<vmem>>, %arg3: memref<16x1xf32, #tpu.memory_space<vmem>>, %arg4: memref<16x1xf32, #tpu.memory_space<vmem>>, %arg5: memref<16x1xf32, #tpu.memory_space<vmem>>, %arg6: memref<1x256xf32, #tpu.memory_space<vmem>>, %arg7: memref<1x256xf32, #tpu.memory_space<vmem>>, %arg8: memref<256x256xbf16, #tpu.memory_space<vmem>>, %arg9: memref<256x256xbf16, #tpu.memory_space<vmem>>, %arg10: memref<256x256xbf16, #tpu.memory_space<vmem>>, %arg11: memref<256x256xbf16, #tpu.memory_space<vmem>>, %arg12: memref<16x256xf32, #tpu.memory_space<vmem>>, %arg13: memref<16x256xbf16, #tpu.memory_space<vmem>>, %arg14: memref<16x256xf32, #tpu.memory_space<vmem>>) attributes {dimension_semantics = [#tpu.dimension_semantics<parallel>, #tpu.dimension_semantics<arbitrary>], iteration_bounds = array<i64: 2, 1>, scalar_prefetch = 0 : i64, scratch_operands = 2 : i64, tpu.core_type = #tpu.core_type<tc>, window_params = [{transform_indices = @transform_0, window_bounds = array<i64: 16, 256>}, {transform_indices = @transform_1, window_bounds = array<i64: 16, 1>}, {transform_indices = @transform_2, window_bounds = array<i64: 16, 1>}, {transform_indices = @transform_3, window_bounds = array<i64: 16, 1>}, {pipeline_mode = #tpu.pipeline_mode<synchronous>, transform_indices = @transform_4, window_bounds = array<i64: 1, 256>}, {pipeline_mode = #tpu.pipeline_mode<synchronous>, transform_indices = @transform_5, window_bounds = array<i64: 1, 256>}, {pipeline_mode = #tpu.pipeline_mode<synchronous>, transform_indices = @transform_6, window_bounds = array<i64: 256, 256>}, {pipeline_mode = #tpu.pipeline_mode<synchronous>, transform_indices = @transform_7, window_bounds = array<i64: 256, 256>}, {pipeline_mode = #tpu.pipeline_mode<synchronous>, transform_indices = @transform_8, window_bounds = array<i64: 256, 256>}, {pipeline_mode = #tpu.pipeline_mode<synchronous>, transform_indices = @transform_9, window_bounds = array<i64: 256, 256>}, {transform_indices = @transform_10, window_bounds = array<i64: 16, 256>}]} {
    %c0_i32 = arith.constant 0 : i32
    %0 = arith.cmpi eq, %arg1, %c0_i32 : i32
    %1 = arith.extui %0 : i1 to i32
    %c0_i32_0 = arith.constant 0 : i32
    %2 = arith.cmpi ne, %1, %c0_i32_0 : i32
    scf.if %2 {
      %c0_31 = arith.constant 0 : index
      %c0_32 = arith.constant 0 : index
      %57 = vector.load %arg6[%c0_31, %c0_32] : memref<1x256xf32, #tpu.memory_space<vmem>>, vector<1x256xf32>
      %c0_33 = arith.constant 0 : index
      %c0_34 = arith.constant 0 : index
      %58 = vector.load %arg3[%c0_33, %c0_34] : memref<16x1xf32, #tpu.memory_space<vmem>>, vector<16x1xf32>
      %c0_35 = arith.constant 0 : index
      %c0_36 = arith.constant 0 : index
      %59 = vector.load %arg4[%c0_35, %c0_36] : memref<16x1xf32, #tpu.memory_space<vmem>>, vector<16x1xf32>
      %60 = math.absf %59 : vector<16x1xf32>
      %cst_37 = arith.constant 9.99999996E-13 : f32
      %61 = vector.broadcast %cst_37 : f32 to vector<16x1xf32>
      %62 = arith.addf %60, %61 : vector<16x1xf32>
      %cst_38 = arith.constant 1.000000e-01 : f32
      %63 = vector.broadcast %cst_38 : f32 to vector<16x1xf32>
      %64 = arith.mulf %62, %63 : vector<16x1xf32>
      %cst_39 = arith.constant 1.000000e+00 : f32
      %65 = vector.broadcast %cst_39 : f32 to vector<16x1xf32>
      %66 = arith.divf %65, %64 : vector<16x1xf32>
      %cst_40 = arith.constant 0.398942292 : f32
      %67 = vector.broadcast %cst_40 : f32 to vector<16x1xf32>
      %68 = arith.mulf %66, %67 : vector<16x1xf32>
      %cst_41 = arith.constant 5.000000e-01 : f32
      %69 = vector.broadcast %cst_41 : f32 to vector<16x1xf32>
      %70 = arith.mulf %69, %66 : vector<16x1xf32>
      %71 = arith.mulf %70, %66 : vector<16x1xf32>
      %72 = vector.broadcast %57 : vector<1x256xf32> to vector<16x256xf32>
      %73 = vector.broadcast %58 : vector<16x1xf32> to vector<16x256xf32>
      %74 = arith.subf %72, %73 : vector<16x256xf32>
      %75 = arith.mulf %74, %74 : vector<16x256xf32>
      %cst_42 = arith.constant 0.000000e+00 : f32
      %76 = vector.broadcast %cst_42 : f32 to vector<16x256xf32>
      %77 = arith.subf %76, %75 : vector<16x256xf32>
      %78 = vector.broadcast %71 : vector<16x1xf32> to vector<16x256xf32>
      %79 = arith.mulf %77, %78 : vector<16x256xf32>
      %80 = math.exp %79 : vector<16x256xf32>
      %81 = vector.broadcast %68 : vector<16x1xf32> to vector<16x256xf32>
      %82 = arith.mulf %81, %80 : vector<16x256xf32>
      %c0_43 = arith.constant 0 : index
      %c0_44 = arith.constant 0 : index
      %83 = vector.load %arg2[%c0_43, %c0_44] : memref<16x256xf32, #tpu.memory_space<vmem>>, vector<16x256xf32>
      %84 = arith.mulf %83, %82 : vector<16x256xf32>
      %85 = arith.truncf %84 : vector<16x256xf32> to vector<16x256xbf16>
      %c0_45 = arith.constant 0 : index
      %c0_46 = arith.constant 0 : index
      %86 = vector.load %arg13[%c0_45, %c0_46] : memref<16x256xbf16, #tpu.memory_space<vmem>>, vector<16x256xbf16>
      tpu.vector_store %arg13[%c0_45, %c0_46], %85 {strides = array<i32>} : memref<16x256xbf16, #tpu.memory_space<vmem>>, vector<16x256xbf16>,
      %cst_47 = arith.constant 0.000000e+00 : f32
      %87 = vector.broadcast %cst_47 : f32 to vector<16x256xf32>
      %c0_48 = arith.constant 0 : index
      %c0_49 = arith.constant 0 : index
      %88 = vector.load %arg14[%c0_48, %c0_49] : memref<16x256xf32, #tpu.memory_space<vmem>>, vector<16x256xf32>
      tpu.vector_store %arg14[%c0_48, %c0_49], %87 {strides = array<i32>} : memref<16x256xf32, #tpu.memory_space<vmem>>, vector<16x256xf32>,
    } else {
    }
    %c0 = arith.constant 0 : index
    %c0_1 = arith.constant 0 : index
    %3 = vector.load %arg13[%c0, %c0_1] : memref<16x256xbf16, #tpu.memory_space<vmem>>, vector<16x256xbf16>
    %c0_2 = arith.constant 0 : index
    %c0_3 = arith.constant 0 : index
    %4 = vector.load %arg8[%c0_2, %c0_3] : memref<256x256xbf16, #tpu.memory_space<vmem>>, vector<256x256xbf16>
    %cst = arith.constant dense<0.000000e+00> : vector<16x256xf32>
    %5 = tpu.matmul %3, %4, %cst {dimension_numbers = #tpu.dot_dimension_numbers<[1], [0], [0], [1], [0, 0, 1, 1], [], []>} : vector<16x256xbf16>, vector<256x256xbf16>, vector<16x256xf32> -> vector<16x256xf32>
    %c0_4 = arith.constant 0 : index
    %c0_5 = arith.constant 0 : index
    %6 = vector.load %arg9[%c0_4, %c0_5] : memref<256x256xbf16, #tpu.memory_space<vmem>>, vector<256x256xbf16>
    %cst_6 = arith.constant dense<0.000000e+00> : vector<16x256xf32>
    %7 = tpu.matmul %3, %6, %cst_6 {dimension_numbers = #tpu.dot_dimension_numbers<[1], [0], [0], [1], [0, 0, 1, 1], [], []>} : vector<16x256xbf16>, vector<256x256xbf16>, vector<16x256xf32> -> vector<16x256xf32>
    %c0_7 = arith.constant 0 : index
    %c0_8 = arith.constant 0 : index
    %8 = vector.load %arg5[%c0_7, %c0_8] : memref<16x1xf32, #tpu.memory_space<vmem>>, vector<16x1xf32>
    %cst_9 = arith.constant 1.98449612 : f32
    %9 = vector.broadcast %cst_9 : f32 to vector<16x1xf32>
    %10 = arith.mulf %8, %9 : vector<16x1xf32>
    %11 = math.floor %10 : vector<16x1xf32>
    %12 = arith.subf %10, %11 : vector<16x1xf32>
    %cst_10 = arith.constant 2.560000e+02 : f32
    %13 = vector.broadcast %cst_10 : f32 to vector<16x1xf32>
    %14 = arith.mulf %12, %13 : vector<16x1xf32>
    %15 = math.floor %14 : vector<16x1xf32>
    %16 = arith.subf %14, %15 : vector<16x1xf32>
    %17 = arith.sitofp %arg1 : i32 to f32
    %18 = vector.broadcast %17 : f32 to vector<16x1xf32>
    %19 = arith.mulf %18, %16 : vector<16x1xf32>
    %20 = math.floor %19 : vector<16x1xf32>
    %21 = arith.subf %19, %20 : vector<16x1xf32>
    %c0_11 = arith.constant 0 : index
    %c0_12 = arith.constant 0 : index
    %22 = vector.load %arg7[%c0_11, %c0_12] : memref<1x256xf32, #tpu.memory_space<vmem>>, vector<1x256xf32>
    %23 = vector.broadcast %22 : vector<1x256xf32> to vector<16x256xf32>
    %24 = vector.broadcast %12 : vector<16x1xf32> to vector<16x256xf32>
    %25 = arith.mulf %23, %24 : vector<16x256xf32>
    %26 = vector.broadcast %21 : vector<16x1xf32> to vector<16x256xf32>
    %27 = arith.addf %25, %26 : vector<16x256xf32>
    %cst_13 = arith.constant 5.000000e-01 : f32
    %28 = vector.broadcast %cst_13 : f32 to vector<16x256xf32>
    %29 = arith.addf %27, %28 : vector<16x256xf32>
    %30 = math.floor %29 : vector<16x256xf32>
    %31 = arith.subf %27, %30 : vector<16x256xf32>
    %cst_14 = arith.constant 6.28318548 : f32
    %32 = vector.broadcast %cst_14 : f32 to vector<16x256xf32>
    %33 = arith.mulf %32, %31 : vector<16x256xf32>
    %34 = math.cos %33 : vector<16x256xf32>
    %35 = math.sin %33 : vector<16x256xf32>
    %36 = arith.mulf %5, %34 : vector<16x256xf32>
    %37 = arith.mulf %7, %35 : vector<16x256xf32>
    %38 = arith.subf %36, %37 : vector<16x256xf32>
    %39 = arith.mulf %5, %35 : vector<16x256xf32>
    %40 = arith.mulf %7, %34 : vector<16x256xf32>
    %41 = arith.addf %39, %40 : vector<16x256xf32>
    %c0_15 = arith.constant 0 : index
    %c0_16 = arith.constant 0 : index
    %42 = vector.load %arg14[%c0_15, %c0_16] : memref<16x256xf32, #tpu.memory_space<vmem>>, vector<16x256xf32>
    %43 = arith.truncf %38 : vector<16x256xf32> to vector<16x256xbf16>
    %c0_17 = arith.constant 0 : index
    %c0_18 = arith.constant 0 : index
    %44 = vector.load %arg10[%c0_17, %c0_18] : memref<256x256xbf16, #tpu.memory_space<vmem>>, vector<256x256xbf16>
    %cst_19 = arith.constant dense<0.000000e+00> : vector<16x256xf32>
    %45 = tpu.matmul %43, %44, %cst_19 {dimension_numbers = #tpu.dot_dimension_numbers<[1], [0], [0], [1], [0, 0, 1, 1], [], []>} : vector<16x256xbf16>, vector<256x256xbf16>, vector<16x256xf32> -> vector<16x256xf32>
    %46 = arith.addf %42, %45 : vector<16x256xf32>
    %c0_20 = arith.constant 0 : index
    %c0_21 = arith.constant 0 : index
    %47 = vector.load %arg14[%c0_20, %c0_21] : memref<16x256xf32, #tpu.memory_space<vmem>>, vector<16x256xf32>
    tpu.vector_store %arg14[%c0_20, %c0_21], %46 {strides = array<i32>} : memref<16x256xf32, #tpu.memory_space<vmem>>, vector<16x256xf32>,
    %c0_22 = arith.constant 0 : index
    %c0_23 = arith.constant 0 : index
    %48 = vector.load %arg14[%c0_22, %c0_23] : memref<16x256xf32, #tpu.memory_space<vmem>>, vector<16x256xf32>
    %49 = arith.truncf %41 : vector<16x256xf32> to vector<16x256xbf16>
    %c0_24 = arith.constant 0 : index
    %c0_25 = arith.constant 0 : index
    %50 = vector.load %arg11[%c0_24, %c0_25] : memref<256x256xbf16, #tpu.memory_space<vmem>>, vector<256x256xbf16>
    %cst_26 = arith.constant dense<0.000000e+00> : vector<16x256xf32>
    %51 = tpu.matmul %49, %50, %cst_26 {dimension_numbers = #tpu.dot_dimension_numbers<[1], [0], [0], [1], [0, 0, 1, 1], [], []>} : vector<16x256xbf16>, vector<256x256xbf16>, vector<16x256xf32> -> vector<16x256xf32>
    %52 = arith.addf %48, %51 : vector<16x256xf32>
    %c0_27 = arith.constant 0 : index
    %c0_28 = arith.constant 0 : index
    %53 = vector.load %arg14[%c0_27, %c0_28] : memref<16x256xf32, #tpu.memory_space<vmem>>, vector<16x256xf32>
    tpu.vector_store %arg14[%c0_27, %c0_28], %52 {strides = array<i32>} : memref<16x256xf32, #tpu.memory_space<vmem>>, vector<16x256xf32>,
    %c0_i32_29 = arith.constant 0 : i32
    %54 = arith.cmpi eq, %arg1, %c0_i32_29 : i32
    %55 = arith.extui %54 : i1 to i32
    %c0_i32_30 = arith.constant 0 : i32
    %56 = arith.cmpi ne, %55, %c0_i32_30 : i32
    scf.if %56 {
      %c0_31 = arith.constant 0 : index
      %c0_32 = arith.constant 0 : index
      %57 = vector.load %arg14[%c0_31, %c0_32] : memref<16x256xf32, #tpu.memory_space<vmem>>, vector<16x256xf32>
      %c0_33 = arith.constant 0 : index
      %c0_34 = arith.constant 0 : index
      %58 = vector.load %arg12[%c0_33, %c0_34] : memref<16x256xf32, #tpu.memory_space<vmem>>, vector<16x256xf32>
      tpu.vector_store %arg12[%c0_33, %c0_34], %57 {strides = array<i32>} : memref<16x256xf32, #tpu.memory_space<vmem>>, vector<16x256xf32>,
    } else {
    }
    return
  }
  func.func @transform_0(%arg0: i32, %arg1: i32) -> (i32, i32) {
    %c0_i32 = arith.constant 0 : i32
    %c0_i32_0 = arith.constant 0 : i32
    return %arg0, %c0_i32 : i32, i32
  }
  func.func @transform_1(%arg0: i32, %arg1: i32) -> (i32, i32) {
    %c0_i32 = arith.constant 0 : i32
    %c0_i32_0 = arith.constant 0 : i32
    return %arg0, %c0_i32 : i32, i32
  }
  func.func @transform_2(%arg0: i32, %arg1: i32) -> (i32, i32) {
    %c0_i32 = arith.constant 0 : i32
    %c0_i32_0 = arith.constant 0 : i32
    return %arg0, %c0_i32 : i32, i32
  }
  func.func @transform_3(%arg0: i32, %arg1: i32) -> (i32, i32) {
    %c0_i32 = arith.constant 0 : i32
    %c0_i32_0 = arith.constant 0 : i32
    return %arg0, %c0_i32 : i32, i32
  }
  func.func @transform_4(%arg0: i32, %arg1: i32) -> (i32, i32) {
    %c0_i32 = arith.constant 0 : i32
    %c0_i32_0 = arith.constant 0 : i32
    %c0_i32_1 = arith.constant 0 : i32
    return %c0_i32, %c0_i32_0 : i32, i32
  }
  func.func @transform_5(%arg0: i32, %arg1: i32) -> (i32, i32) {
    %c0_i32 = arith.constant 0 : i32
    %c0_i32_0 = arith.constant 0 : i32
    %c0_i32_1 = arith.constant 0 : i32
    return %c0_i32, %c0_i32_0 : i32, i32
  }
  func.func @transform_6(%arg0: i32, %arg1: i32) -> (i32, i32) {
    %c0_i32 = arith.constant 0 : i32
    %c0_i32_0 = arith.constant 0 : i32
    return %c0_i32, %arg1 : i32, i32
  }
  func.func @transform_7(%arg0: i32, %arg1: i32) -> (i32, i32) {
    %c0_i32 = arith.constant 0 : i32
    %c0_i32_0 = arith.constant 0 : i32
    return %c0_i32, %arg1 : i32, i32
  }
  func.func @transform_8(%arg0: i32, %arg1: i32) -> (i32, i32) {
    %c0_i32 = arith.constant 0 : i32
    %c0_i32_0 = arith.constant 0 : i32
    return %arg1, %c0_i32 : i32, i32
  }
  func.func @transform_9(%arg0: i32, %arg1: i32) -> (i32, i32) {
    %c0_i32 = arith.constant 0 : i32
    %c0_i32_0 = arith.constant 0 : i32
    return %arg1, %c0_i32 : i32, i32
  }
  func.func @transform_10(%arg0: i32, %arg1: i32) -> (i32, i32) {
    %c0_i32 = arith.constant 0 : i32
    %c0_i32_0 = arith.constant 0 : i32
    return %arg0, %c0_i32 : i32, i32
  }
}

</mosaic_0001>

<bundles_post_ra>
// kernel: tpu_custom_call.1
= control target key start
LH: loop header
LB: loop body
LE: loop exit
PB: predicated region body
PF: predicated region fallthrough
CT: control target
= control target key end

     0   :  { %s4349_s0 = inlined_call_operand.vmem [shape: f32[32,256], index: 0, kind: input, shape index: {}]   ;;  %s4350_s1 = inlined_call_operand.vmem [shape: f32[32,1], index: 1, kind: input, shape index: {}]   ;;  %s4351_s2 = inlined_call_operand.vmem [shape: f32[32,1], index: 2, kind: input, shape index: {}]   ;;  %s4352_s3 = inlined_call_operand.vmem [shape: f32[32,1], index: 3, kind: input, shape index: {}]   ;;  %s4353_s4 = inlined_call_operand.vmem [shape: f32[1,256], index: 4, kind: input, shape index: {}]   ;;  %s4354_s5 = inlined_call_operand.vmem [shape: f32[1,256], index: 5, kind: input, shape index: {}]   ;;  %s4355_s6 = inlined_call_operand.hbm [shape: bf16[256,256], index: 6, kind: input, shape index: {}]   ;;  %s4356_s7 = inlined_call_operand.hbm [shape: bf16[256,256], index: 7, kind: input, shape index: {}]   ;;  %s4357_s8 = inlined_call_operand.hbm [shape: bf16[256,256], index: 8, kind: input, shape index: {}]   ;;  %s4358_s9 = inlined_call_operand.hbm [shape: bf16[256,256], index: 9, kind: input, shape index: {}]   ;;  %s4359_s10 = inlined_call_operand.hbm [shape: f32[32,256], index: 10, kind: output, shape index: {}]  }
   0x1   :  { %4372 = sst [smem:[#allocation24_spill]] %s4356_s7 }
   0x2   :  { %4373 = sst [smem:[#allocation25_spill]] %s4359_s10 }
   0x3   :  { %15 = vsyncpa [#allocation5], 0 }
   0x4   :  { %16 = vsyncpa [#allocation8], 0 }
   0x5   :  { %17 = vsyncpa [#allocation11], 0 }
   0x6   :  { %18 = vsyncpa [#allocation6], 0 }
   0x7   :  { %20 = vsyncpa [#allocation6 + $0x1], 0  ;;  %s3546_s13 = smov 0   ;;  %s3548_s14 = smov 0  }
   0x8   :  { %s3550_s15 = smov 0   ;;  %s3552_s16 = smov 0  }
   0x9   :  { %s3554_s17 = smov 0   ;;  %s3556_s18 = smov 0  }
   0xa LB: > { %4374 = sst [smem:[#allocation17_spill]] %s3453_s13  ;;  %s2730_s19 = sadd.s32 4294967295, %s3473_s18   ;;  %s3473_s18 = sphi %s3556_s18, %s26_s18   ;;  %s3469_s17 = sphi %s3554_s17, %s4401_s17   ;;  %s3465_s16 = sphi %s3552_s16, %s4400_s16   ;;  %s3461_s15 = sphi %s3550_s15, %s4399_s15   ;;  %s3457_s14 = sphi %s3548_s14, %s4403_s14   ;;  %s3453_s13 = sphi %s3546_s13, %s4402_s13  }
   0xb   : > { %4375 = sst [smem:[#allocation18_spill]] %s3461_s15  ;;  %s2731_s20 = sadd.s32 4294967294, %s3473_s18  }
   0xc   : > { %4376 = sst [smem:[#allocation19_spill]] %s3469_s17  ;;  %s38_s21 = sadd.s32 1, %s3469_s17 }
   0xd   : > { %4377 = sst [smem:[#allocation20_spill]] %s3473_s18  ;;  %s295_s22 = sadd.s32 1, %s3461_s15 }
   0xe   : > { %p40_p0 = scmp.ge.s32.totalorder %s38_s21, 2  ;;  %p305_p1 = scmp.ne.s32.totalorder %s3461_s15, %s3457_s14 }
   0xf   : > { %p306_p2 = scmp.eq.s32.totalorder %s2730_s19, 1  ;;  %p311_p3 = scmp.ne.s32.totalorder %s3457_s14, %s3453_s13 }
  0x10   : > { %s4405_s21 = smov (%p40_p0, %s38_s21), 0  ;;  %p312_p5 = scmp.eq.s32.totalorder %s2731_s20, 1 }
  0x11   : > { %4378 = sst [smem:[#allocation21_spill]] %s4405_s21  ;;  %p3586_p4 = por %p306_p2, %p305_p1 }
  0x12   : > { %s292_s24 = ssub.s32 %s3469_s17, %s4405_s21  ;;  %p2732_p6 = scmp.ge.s32.totalorder %s3473_s18, 1 }
  0x13   : > { %s4379_s23 = scalar_select %p3586_p4, 1, 0 }
  0x14   : > { %p293_p7 = scmp.eq.s32.totalorder %s292_s24, 0  ;;  %p3593_p8 = por %p312_p5, %p311_p3 }
  0x15   : > { %p319_p9 = scmp.lt.s32.totalorder %s3473_s18, 3  ;;  %p3605_p11 = scmp.eq.s32.totalorder %s2730_s19, 0 }
  0x16   : > { %s4380_s25 = scalar_select %p3593_p8, 1, 0 }
  0x17   : > { %s3599_s26 = scalar_select %p293_p7, %s3461_s15, %s295_s22  }
  0x18   : > { %4381 = sst [smem:[#allocation22_spill]] %s4380_s25  ;;  %p3601_p10 = pnand %p2732_p6, %p319_p9 }
  0x19   : > { %4382 = sst [smem:[#allocation23_spill]] %s3599_s26  ;;  %s3475_s29 = smov [#allocation7]  }
  0x1a   : > { %s4383_s27 = scalar_select %p3601_p10, 1, 0 }
  0x1b   : > { %s4384_s28 = scalar_select %p3605_p11, 1, 0 }
  0x1c   : > { %p2960_p12 = pneg %p3601_p10  ;;  %s356_s30 = sshll.u32 %s3475_s29, 4  ;;  %s357_s30 = int_to_ptr.vmem [resolvable:$true] %s356_s30 }
  0x1d   : > { %s3476_s12 = smov [#allocation4]   ;;  %s4386_s7 = sld [smem:[#allocation24_spill]] }
  0x1e   : > { %p3613_p13 = pnand %p3605_p11, %p2960_p12  ;;  %s340_s20 = sshll.u32 %s3476_s12, 4  ;;  %s341_s20 = int_to_ptr.vmem [resolvable:$true] %s340_s20 }
  0x20   : > { %p3625_p1 = pneg %p3613_p13 }
  0x23   : > { %s3271_s19 = scalar_lea.hbm %s4386_s7, 4096 }
  0x24   : > { %p3272_p0 = scmp.ne.s32.totalorder %s4386_s7, %s3271_s19  ;;  %p3278_p5 = scmp.lt.u32.totalorder %s3271_s19, %s4386_s7 }
  0x26   : > { %p3274_p2 = pnand %p3625_p1, %p3272_p0 }
  0x28   : > { %p3275_p3 = pneg %p3274_p2 }
  0x2a   : > { %p3280_p6 = pnand %p3278_p5, %p3275_p3 }
  0x2c   : > { %3283 = shalt.err (!%p3280_p6)
}
  0x2d   : > { %s3284_s12 = scalar_lea.vmem %s357_s30, 4096  ;;  %p3292_p8 = scmp.lt.s32.totalorder %s357_s30, %s357_s30 }
  0x2e   : > { %p3285_p7 = scmp.ne.s32.totalorder %s357_s30, %s3284_s12  ;;  %p3293_p4 = scmp.lt.s32.totalorder %s3284_s12, %s3284_s12 }
  0x30   : > { %p3287_p9 = pnand %p3285_p7, %p3625_p1  ;;  %p3294_p11 = por %p3293_p4, %p3292_p8 }
  0x32   : > { %p3288_p12 = pneg %p3287_p9 }
  0x34   : > { %p3295_p10 = pnand %p3294_p11, %p3288_p12 }
  0x36   : > { %3298 = shalt.err (!%p3295_p10)
}
  0x37   : > { %s3477_s17 = smov 128   ;;  %s3478_s21 = smov 8  }
  0x38   : > { %2966 = dma.hbm_to_vmem [thread:$0]  (!%p3613_p13), %s4386_s7, 4096, %s357_s30, [#allocation8], %s3477_s17, %s3477_s17, %s3478_s21  }
  0x39   : > { %s3299_s19 = scalar_lea.hbm %s4355_s6, 4096 }
  0x3a   : > { %p3300_p4 = scmp.ne.s32.totalorder %s4355_s6, %s3299_s19  ;;  %p3306_p11 = scmp.lt.u32.totalorder %s3299_s19, %s4355_s6 }
  0x3c   : > { %p3302_p8 = pnand %p3300_p4, %p3625_p1 }
  0x3e   : > { %p3303_p10 = pneg %p3302_p8 }
  0x40   : > { %p3308_p0 = pnand %p3306_p11, %p3303_p10 }
  0x42   : > { %3311 = shalt.err (!%p3308_p0)
}
  0x43   : > { %s3312_s15 = scalar_lea.vmem %s341_s20, 4096  ;;  %p3320_p6 = scmp.lt.s32.totalorder %s341_s20, %s341_s20 }
  0x44   : > { %p3313_p2 = scmp.ne.s32.totalorder %s341_s20, %s3312_s15  ;;  %p3321_p7 = scmp.lt.s32.totalorder %s3312_s15, %s3312_s15 }
  0x46   : > { %p3315_p3 = pnand %p3313_p2, %p3625_p1  ;;  %p3322_p9 = por %p3321_p7, %p3320_p6 }
  0x48   : > { %p3316_p5 = pneg %p3315_p3 }
  0x4a   : > { %p3323_p12 = pnand %p3322_p9, %p3316_p5 }
  0x4c   : > { %3326 = shalt.err (!%p3323_p12)
}
  0x4d   : > { %2963 = dma.hbm_to_vmem [thread:$0]  (!%p3613_p13), %s4355_s6, 4096, %s341_s20, [#allocation5], %s3477_s17, %s3477_s17, %s3478_s21  }
  0x4e   : > { %s3479_s25 = smov [#allocation9]   ;;  %s3480_s26 = smov [#allocation10]  }
  0x4f   : > { %s373_s30 = sshll.u32 %s3479_s25, 4  ;;  %s390_s22 = sshll.u32 %s3480_s26, 4  ;;  %s374_s30 = int_to_ptr.vmem [resolvable:$true] %s373_s30  ;;  %s391_s22 = int_to_ptr.vmem [resolvable:$true] %s390_s22 }
  0x50   : > { %s3327_s12 = scalar_lea.hbm %s4357_s8, 4096 }
  0x51   : > { %p3328_p4 = scmp.ne.s32.totalorder %s4357_s8, %s3327_s12  ;;  %p3334_p11 = scmp.lt.u32.totalorder %s3327_s12, %s4357_s8 }
  0x53   : > { %p3330_p8 = pnand %p3328_p4, %p3625_p1 }
  0x55   : > { %p3331_p10 = pneg %p3330_p8 }
  0x57   : > { %p3336_p0 = pnand %p3334_p11, %p3331_p10 }
  0x59   : > { %3339 = shalt.err (!%p3336_p0)
}
  0x5a   : > { %s3340_s20 = scalar_lea.vmem %s374_s30, 4096  ;;  %p3348_p6 = scmp.lt.s32.totalorder %s374_s30, %s374_s30 }
  0x5b   : > { %p3341_p2 = scmp.ne.s32.totalorder %s374_s30, %s3340_s20  ;;  %p3349_p7 = scmp.lt.s32.totalorder %s3340_s20, %s3340_s20 }
  0x5d   : > { %p3343_p3 = pnand %p3341_p2, %p3625_p1  ;;  %p3350_p9 = por %p3349_p7, %p3348_p6 }
  0x5f   : > { %p3344_p5 = pneg %p3343_p3 }
  0x61   : > { %p3351_p12 = pnand %p3350_p9, %p3344_p5 }
  0x63   : > { %3354 = shalt.err (!%p3351_p12)
}
  0x64   : > { %2969 = dma.hbm_to_vmem [thread:$0]  (!%p3613_p13), %s4357_s8, 4096, %s374_s30, [#allocation8], %s3477_s17, %s3477_s17, %s3478_s21  }
  0x65   : > { %s3355_s26 = scalar_lea.hbm %s4358_s9, 4096 }
  0x66   : > { %p3356_p4 = scmp.ne.s32.totalorder %s4358_s9, %s3355_s26  ;;  %p3362_p11 = scmp.lt.u32.totalorder %s3355_s26, %s4358_s9 }
  0x68   : > { %p3358_p8 = pnand %p3356_p4, %p3625_p1 }
  0x6a   : > { %p3359_p10 = pneg %p3358_p8 }
  0x6c   : > { %p3364_p0 = pnand %p3362_p11, %p3359_p10 }
  0x6e   : > { %3367 = shalt.err (!%p3364_p0)
}
  0x6f   : > { %s3368_s13 = scalar_lea.vmem %s391_s22, 4096  ;;  %p3376_p6 = scmp.lt.s32.totalorder %s391_s22, %s391_s22 }
  0x70   : > { %p3369_p2 = scmp.ne.s32.totalorder %s391_s22, %s3368_s13  ;;  %p3377_p7 = scmp.lt.s32.totalorder %s3368_s13, %s3368_s13 }
  0x72   : > { %p3371_p3 = pnand %p3369_p2, %p3625_p1  ;;  %p3378_p9 = por %p3377_p7, %p3376_p6 }
  0x74   : > { %p3372_p5 = pneg %p3371_p3 }
  0x76   : > { %p3379_p12 = pnand %p3378_p9, %p3372_p5 }
  0x78   : > { %3382 = shalt.err (!%p3379_p12)
}
  0x79   : > { %2972 = dma.hbm_to_vmem [thread:$0]  (!%p3613_p13), %s4358_s9, 4096, %s391_s22, [#allocation11], %s3477_s17, %s3477_s17, %s3478_s21  }
  0x7a   : > { %p4388_p4 = scmp.ne.s32.totalorder %s4383_s27, 0 }
  0x7b   : > { %p4389_p1 = scmp.ne.s32.totalorder (!%p4388_p4), %s4384_s28, 0 }
  0x7c   : > { %443 = sbr.rel (%p4388_p4) target bundleno = 900 (0x384), region = 60 }
  0x83   : > { %3436 = dma.done.wait (%p4389_p1), [#allocation5], 4096  }
  0x84   : > { %3438 = vsyncadd (%p4389_p1), [#allocation5], 4294963200 }
  0x85   : > { %3440 = dma.done.wait (%p4389_p1), [#allocation8], 8192  }
  0x86   : > { %3442 = vsyncadd (%p4389_p1), [#allocation8], 4294959104 }
  0x87   : > { %3444 = dma.done.wait (%p4389_p1), [#allocation11], 4096  }
  0x88   : > { %3446 = vsyncadd (%p4389_p1), [#allocation11], 4294963200  ;;  %s2744_s27 = sshll.u32 %s3465_s16, 1  ;;  %v3481_v0 = vmov 0   ;;  %v3051_v10 = vld [vmem:[#allocation4 + $0x4] ss:$8 sps:$4 sm:$0xff]  }
  0x89   : > { %3049 = vset.pattern.permute.xlu0 %v3481_v0  ;;  %p510_p13 = scmp.lt.s32.totalorder %s2744_s27, 3  ;;  %3050 = vset.pattern.permute.xlu1 %v3481_v0  ;;  %v3053_v15 = vld [vmem:[#allocation4] ss:$8 sps:$4 sm:$0xff]   ;;  %v3054_v19 = vld [vmem:[#allocation4 + $0x14] ss:$8 sps:$4 sm:$0xff]   ;;  %p4393_p10 = scmp.ne.s32.totalorder %s4379_s23, 0 }
  0x8a   : > { %843 = vmatprep.subr.bf16.mxu1 %v3051_v10  ;;  %v3056_v21 = vld [vmem:[#allocation4 + $0x10] ss:$8 sps:$4 sm:$0xff]   ;;  %v3057_v23 = vld [vmem:[#allocation4 + $0x24] ss:$8 sps:$4 sm:$0xff]   ;;  %v3059_v26 = vld [vmem:[#allocation4 + $0x20] ss:$8 sps:$4 sm:$0xff]  }
  0x8b   : > { %s4407_s27 = smov (!%p510_p13, %s2744_s27), 3  ;;  %844 = vmatpush1.bf16.msra.mxu1 %v3053_v15  ;;  %v3060_v27 = vld [vmem:[#allocation4 + $0x34] ss:$8 sps:$4 sm:$0xff]   ;;  %v3062_v30 = vld [vmem:[#allocation4 + $0x30] ss:$8 sps:$4 sm:$0xff]  }
  0x8c   : > { %s2748_s11 = sshll.u32 %s4407_s27, 3  ;;  %845 = vmatprep.subr.bf16.mxu1 %v3054_v19  ;;  %v3063_v31 = vld [vmem:[#allocation4 + $0x44] ss:$8 sps:$4 sm:$0xff]   ;;  %v3065_v33 = vld [vmem:[#allocation4 + $0x40] ss:$8 sps:$4 sm:$0xff]   ;;  %s2919_s19 = sshll.u32 %s4407_s27, 4 }
  0x8d   : > { %s520_s21 = scalar_lea.vmem %s4350_s1, %s2748_s11  ;;  %s526_s10 = scalar_lea.vmem %s4351_s2, %s2748_s11  ;;  %v3066_v39 = vld [vmem:[#allocation4 + $0x54] ss:$8 sps:$4 sm:$0xff]   ;;  %v3068_v45 = vld [vmem:[#allocation4 + $0x50] ss:$8 sps:$4 sm:$0xff]   ;;  %v3069_v46 = vld [vmem:[#allocation4 + $0x64] ss:$8 sps:$4 sm:$0xff]  }
  0x8e   : > { %s532_s25 = scalar_lea.vmem %s4352_s3, %s2748_s11  ;;  %v544_v1 = vld [vmem:[%s520_s21] sm:$0xff]  ;;  %v545_v2 = vld [vmem:[%s520_s21 + $0x8] sm:$0xff]  ;;  %v3072_v51 = vld [vmem:[#allocation4 + $0x74] ss:$8 sps:$4 sm:$0xff]   ;;  %s514_s13 = scalar_lea.vmem %s4349_s0, %s2919_s19 }
  0x8f   : > { %v546_v3 = vld [vmem:[%s526_s10] sm:$0xff]  ;;  %v547_v4 = vld [vmem:[%s526_s10 + $0x8] sm:$0xff]  ;;  %577 = vperm.xlu0 %3049, %v544_v1   ;;  %846 = vmatpush1.bf16.msra.mxu1 %v3056_v21  ;;  %v3074_v53 = vld [vmem:[#allocation4 + $0x70] ss:$8 sps:$4 sm:$0xff]   ;;  %s506_s27 = sand.u32 1, %s3457_s14   ;;  %s2921_s21 = sshll.u32 %s3465_s16, 9 }
  0x90   : > { %v1121_v5 = vld [vmem:[%s532_s25] sm:$0xff]  ;;  %v548_v6 = vand.u32 2147483647, %v546_v3  ;;  %v549_v7 = vand.u32 2147483647, %v547_v4  ;;  %v1122_v9 = vld [vmem:[%s532_s25 + $0x8] sm:$0xff]  ;;  %847 = vmatprep.subr.bf16.mxu1 %v3057_v23 }
  0x91   : > { %v1123_v8 = vmul.f32 1.9844961, %v1121_v5  ;;  %v1124_v14 = vmul.f32 1.9844961, %v1122_v9  ;;  %v3071_v48 = vld [vmem:[#allocation4 + $0x60] ss:$8 sps:$4 sm:$0xff]  }
  0x92   : > { %v550_v11 = vadd.f32 1e-12, %v548_v6  ;;  %v551_v12 = vadd.f32 1e-12, %v549_v7  ;;  %v3075_v54 = vld [vmem:[#allocation4 + $0x84] ss:$8 sps:$4 sm:$0xff]  }
  0x93   : > { %v1125_v13 = vfloor.f32 %v1123_v8  ;;  %582 = vperm.xlu0 %3049, %v545_v2   ;;  %v1126_v20 = vfloor.f32 %v1124_v14  ;;  %848 = vmatpush1.bf16.msra.mxu1 %v3059_v26  ;;  %v3077_v56 = vld [vmem:[#allocation4 + $0x80] ss:$8 sps:$4 sm:$0xff]   ;;  %v3078_v57 = vld [vmem:[#allocation4 + $0x94] ss:$8 sps:$4 sm:$0xff]   ;;  %v3080_v58 = vld [vmem:[#allocation4 + $0x90] ss:$8 sps:$4 sm:$0xff]  }
  0x94   : > { %v552_v16 = vmul.f32 0.1, %v550_v11  ;;  %v553_v17 = vmul.f32 0.1, %v551_v12  ;;  %849 = vmatprep.subr.bf16.mxu1 %v3060_v27  ;;  %v3081_v59 = vld [vmem:[#allocation4 + $0xa4] ss:$8 sps:$4 sm:$0xff]  }
  0x95   : > { %v1127_v18 = vsub.f32 %v1123_v8, %v1125_v13  ;;  %v1128_v25 = vsub.f32 %v1124_v14, %v1126_v20  ;;  %v3083_v60 = vld [vmem:[#allocation4 + $0xa0] ss:$8 sps:$4 sm:$0xff]   ;;  %v3084_v61 = vld [vmem:[#allocation4 + $0xb4] ss:$8 sps:$4 sm:$0xff]   ;;  %v3086_v62 = vld [vmem:[#allocation4 + $0xb0] ss:$8 sps:$4 sm:$0xff]   ;;  %v565_v8 = vlaneseq }
  0x96   : > { %3243 = vrcp.f32 %v552_v16  ;;  %v3087_v63 = vld [vmem:[#allocation4 + $0xc4] ss:$8 sps:$4 sm:$0xff]   ;;  %v3089_v0 = vld [vmem:[#allocation4 + $0xc0] ss:$8 sps:$4 sm:$0xff]   ;;  %v3090_v1 = vld [vmem:[#allocation4 + $0xd4] ss:$8 sps:$4 sm:$0xff]  }
  0x97   : > { %v1129_v22 = vmul.f32 256.0, %v1127_v18  ;;  %3245 = vrcp.f32 %v553_v17  ;;  %v1130_v29 = vmul.f32 256.0, %v1128_v25  ;;  %850 = vmatpush1.bf16.msra.mxu1 %v3062_v30  ;;  %v3092_v2 = vld [vmem:[#allocation4 + $0xd0] ss:$8 sps:$4 sm:$0xff]   ;;  %v3093_v3 = vld [vmem:[#allocation4 + $0xe4] ss:$8 sps:$4 sm:$0xff]  }
  0x98   : > { %851 = vmatprep.subr.bf16.mxu1 %v3063_v31  ;;  %v3095_v4 = vld [vmem:[#allocation4 + $0xe0] ss:$8 sps:$4 sm:$0xff]   ;;  %v3096_v5 = vld [vmem:[#allocation4 + $0xf4] ss:$8 sps:$4 sm:$0xff]   ;;  %v3098_v6 = vld [vmem:[#allocation4 + $0xf0] ss:$8 sps:$4 sm:$0xff]  }
  0x99   : > { %v1131_v24 = vfloor.f32 %v1129_v22  ;;  %v1132_v38 = vfloor.f32 %v1130_v29  ;;  %v3101_v7 = vld [vmem:[#allocation7 + $0x4] ss:$8 sps:$4 sm:$0xff]   ;;  %v3734_v9 = vshrl.u32 %v565_v8, 7  ;;  %v543_v12 = vld [vmem:[%s4353_s4] sm:$0x3]  ;;  %s2743_s11 = sshll.u32 %s506_s27, 5 }
  0x9a   : > { %s508_s29 = scalar_lea.vmem [#allocation12], %s2743_s11  ;;  %s4392_s10 = sld [smem:[#allocation25_spill]] }
  0x9b   : > { %v1133_v28 = vsub.f32 %v1129_v22, %v1131_v24  ;;  %v1134_v44 = vsub.f32 %v1130_v29, %v1132_v38  ;;  %852 = vmatpush1.bf16.msra.mxu1 %v3065_v33  ;;  %v567_v10 = vsub.s32 0, %v3734_v9  ;;  %v571_v11 = vsub.s32 1, %v3734_v9  ;;  %s2575_s17 = sshll.u32 %s508_s29, 4  ;;  %s4303_s18 = scalar_lea.sflag [#allocation6], %s506_s27  ;;  %s4296_s17 = int_to_ptr.vmem [resolvable:$true] %s2575_s17 }
  0x9c   : > { %853 = vmatprep.subr.bf16.mxu1 %v3066_v39  ;;  %s3383_s16 = scalar_lea.vmem %s4296_s17, 512  ;;  %s3488_s25 = smov [#allocation12]  }
  0x9d   : > { %v1137_v32 = vmul.f32 0.0, %v1133_v28  ;;  %v1138_v50 = vmul.f32 0.0, %v1134_v44  ;;  %v568_v13 = vrot.slane %v543_v12, %v567_v10  ;;  %v572_v14 = vrot.slane %v543_v12, %v571_v11  ;;  %v635_v44 = vld [vmem:[%s514_s13 + $0x10] sm:$0xff]  ;;  %v3119_v12 = vld [vmem:[#allocation7 + $0x64] ss:$8 sps:$4 sm:$0xff]   ;;  %p3384_p8 = scmp.ne.s32.totalorder %s4296_s17, %s3383_s16  ;;  %s3387_s26 = sshll.u32 %s3488_s25, 4  ;;  %s3388_s26 = int_to_ptr.vmem [resolvable:$false] %s3387_s26 }
  0x9e   : > { %s3389_s24 = scalar_lea.vmem %s3388_s26, 1024  ;;  %p3390_p2 = scmp.lt.s32.totalorder %s4296_s17, %s3388_s26 }
  0x9f   : > { %v1139_v42 = vfloor.f32 %v1137_v32  ;;  %854 = vmatpush1.bf16.msra.mxu1 %v3068_v45  ;;  %v1140_v52 = vfloor.f32 %v1138_v50  ;;  %p3385_p11 = pnand %p3384_p8, %p4393_p10  ;;  %p3391_p3 = scmp.lt.s32.totalorder %s3389_s24, %s3383_s16 }
  0xa0   : > { %v3244_v34 = vpop.eup %3243  ;;  %855 = vmatprep.subr.bf16.mxu1 %v3069_v46  ;;  %s4301_s28 = scalar_lea.hbm %s4392_s10, %s2921_s21 }
  0xa1   : > { %v3246_v35 = vpop.eup %3245  ;;  %v558_v36 = vmul.f32 0.3989423, %v3244_v34  ;;  %v560_v37 = vmul.f32 0.5, %v3244_v34  ;;  %v1141_v47 = vsub.f32 %v1137_v32, %v1139_v42  ;;  %v1142_v55 = vsub.f32 %v1138_v50, %v1140_v52  ;;  %v634_v50 = vld [vmem:[%s514_s13 + $0x8] sm:$0xff]  ;;  %p3386_p0 = pneg %p3385_p11  ;;  %p3392_p5 = por %p3391_p3, %p3390_p2 }
  0xa2   : > { %v561_v40 = vmul.f32 0.5, %v3246_v35  ;;  %v559_v49 = vmul.f32 0.3989423, %v3246_v35 }
  0xa3   : > { %621 = vperm.xlu0 %3049, %v558_v36   ;;  %v562_v41 = vmul.f32 %v3244_v34, %v560_v37  ;;  %856 = vmatpush1.bf16.msra.mxu1 %v3071_v48  ;;  %p3393_p6 = pnand %p3392_p5, %p3386_p0 }
  0xa4   : > { %v563_v43 = vmul.f32 %v3246_v35, %v561_v40  ;;  %857 = vmatprep.subr.bf16.mxu1 %v3072_v51  ;;  %v636_v51 = vld [vmem:[%s514_s13 + $0x18] sm:$0xff] }
  0xa5   : > { %599 = vperm.xlu1 %3050, %v562_v41  }
  0xa7   : > { %1157 = vperm.xlu0 %3049, %v1127_v18   ;;  %858 = vmatpush1.bf16.msra.mxu1 %v3074_v53 }
  0xa8   : > { %859 = vmatprep.subr.bf16.mxu1 %v3075_v54 }
  0xa9   : > { %604 = vperm.xlu1 %3050, %v563_v43  }
  0xab   : > { %1171 = vperm.xlu0 %3049, %v1141_v47   ;;  %860 = vmatpush1.bf16.msra.mxu1 %v3077_v56  ;;  %v633_v47 = vld [vmem:[%s514_s13] sm:$0xff] }
  0xac   : > { %861 = vmatprep.subr.bf16.mxu1 %v3078_v57 }
  0xad   : > { %626 = vperm.xlu1 %3050, %v559_v49  }
  0xaf   : > { %862 = vmatpush1.bf16.msra.mxu1 %v3080_v58 }
  0xb0   : > { %863 = vmatprep.subr.bf16.mxu1 %v3081_v59  ;;  %v3099_v59 = vld [vmem:[#allocation7] ss:$8 sps:$4 sm:$0xff]  }
  0xb1   : > { %1162 = vperm.xlu1 %3050, %v1128_v25  }
  0xb3   : > { %864 = vmatpush1.bf16.msra.mxu1 %v3083_v60  ;;  %v3104_v60 = vld [vmem:[#allocation7 + $0x14] ss:$8 sps:$4 sm:$0xff]  }
  0xb4   : > { %865 = vmatprep.subr.bf16.mxu1 %v3084_v61  ;;  %v3102_v61 = vld [vmem:[#allocation7 + $0x10] ss:$8 sps:$4 sm:$0xff]  }
  0xb5   : > { %1176 = vperm.xlu1 %3050, %v1142_v55  }
  0xb7   : > { %866 = vmatpush1.bf16.msra.mxu1 %v3086_v62  ;;  %v3107_v62 = vld [vmem:[#allocation7 + $0x24] ss:$8 sps:$4 sm:$0xff]  }
  0xb8   : > { %867 = vmatprep.subr.bf16.mxu1 %v3087_v63  ;;  %v3105_v63 = vld [vmem:[#allocation7 + $0x20] ss:$8 sps:$4 sm:$0xff]  }
  0xbb   : > { %868 = vmatpush1.bf16.msra.mxu1 %v3089_v0  ;;  %v3110_v0 = vld [vmem:[#allocation7 + $0x34] ss:$8 sps:$4 sm:$0xff]  }
  0xbc   : > { %869 = vmatprep.subr.bf16.mxu1 %v3090_v1  ;;  %v3108_v1 = vld [vmem:[#allocation7 + $0x30] ss:$8 sps:$4 sm:$0xff]  }
  0xbf   : > { %870 = vmatpush1.bf16.msra.mxu1 %v3092_v2  ;;  %v3113_v2 = vld [vmem:[#allocation7 + $0x44] ss:$8 sps:$4 sm:$0xff]  }
  0xc0   : > { %871 = vmatprep.subr.bf16.mxu1 %v3093_v3  ;;  %v3111_v3 = vld [vmem:[#allocation7 + $0x40] ss:$8 sps:$4 sm:$0xff]  }
  0xc3   : > { %872 = vmatpush1.bf16.msra.mxu1 %v3095_v4  ;;  %v3116_v4 = vld [vmem:[#allocation7 + $0x54] ss:$8 sps:$4 sm:$0xff]  }
  0xc4   : > { %873 = vmatprep.subr.bf16.mxu1 %v3096_v5  ;;  %v3755_v5 = vld [vmem:[%s4354_s5] sm:$0x3] }
  0xc5   : > { %v1148_v8 = vrot.slane %v3755_v5, %v567_v10 }
  0xc7   : > { %874 = vmatpush1.bf16.msra.mxu1 %v3098_v6 }
  0xc8   : > { %1078 = vmatprep.subr.bf16.mxu1 %v3101_v7  ;;  %v3114_v7 = vld [vmem:[#allocation7 + $0x50] ss:$8 sps:$4 sm:$0xff]  }
 0x10e   : > { %v578_v15 = vpop.permute.xlu0 %577 }
 0x10f   : > { %v585_v16 = vsub.f32 %v568_v13, %v578_v15  ;;  %v586_v17 = vsub.f32 %v572_v14, %v578_v15 }
 0x111   : > { %v589_v19 = vmul.f32 %v585_v16, %v585_v16  ;;  %v590_v20 = vmul.f32 %v586_v17, %v586_v17  ;;  %v3122_v17 = vld [vmem:[#allocation7 + $0x74] ss:$8 sps:$4 sm:$0xff]  }
 0x112   : > { %v583_v18 = vpop.permute.xlu0 %582 }
 0x113   : > { %v587_v21 = vsub.f32 %v568_v13, %v583_v18  ;;  %v588_v22 = vsub.f32 %v572_v14, %v583_v18  ;;  %v593_v23 = vsub.f32 0.0, %v589_v19  ;;  %v594_v24 = vsub.f32 0.0, %v590_v20  ;;  %v3117_v14 = vld [vmem:[#allocation7 + $0x60] ss:$8 sps:$4 sm:$0xff]   ;;  %v3120_v19 = vld [vmem:[#allocation7 + $0x70] ss:$8 sps:$4 sm:$0xff]  }
 0x114   : > { %v3125_v20 = vld [vmem:[#allocation7 + $0x84] ss:$8 sps:$4 sm:$0xff]  }
 0x115   : > { %v591_v25 = vmul.f32 %v587_v21, %v587_v21  ;;  %v592_v26 = vmul.f32 %v588_v22, %v588_v22 }
 0x117   : > { %v595_v30 = vsub.f32 0.0, %v591_v25  ;;  %v596_v31 = vsub.f32 0.0, %v592_v26 }
 0x122   : > { %v622_v41 = vpop.permute.xlu0 %621 }
 0x124   : > { %v600_v27 = vpop.permute.xlu1 %599 }
 0x125   : > { %v607_v28 = vmul.f32 %v600_v27, %v593_v23  ;;  %v608_v29 = vmul.f32 %v600_v27, %v594_v24  ;;  %v3123_v23 = vld [vmem:[#allocation7 + $0x80] ss:$8 sps:$4 sm:$0xff]   ;;  %v3128_v24 = vld [vmem:[#allocation7 + $0x94] ss:$8 sps:$4 sm:$0xff]   ;;  %v3126_v27 = vld [vmem:[#allocation7 + $0x90] ss:$8 sps:$4 sm:$0xff]  }
 0x126   : > { %v3757_v6 = vpop.permute.xlu0 %1157 }
 0x127   : > { %v611_v32 = vmul.f32 1.442695, %v607_v28  ;;  %v613_v33 = vmul.f32 1.442695, %v608_v29  ;;  %v1165_v15 = vmul.f32 %v3757_v6, %v1148_v8  ;;  %v3131_v28 = vld [vmem:[#allocation7 + $0xa4] ss:$8 sps:$4 sm:$0xff]  }
 0x128   : > { %v605_v34 = vpop.permute.xlu1 %604 }
 0x129   : > { %3247 = vpow2.f32 %v611_v32  ;;  %v609_v35 = vmul.f32 %v605_v34, %v595_v30  ;;  %v610_v36 = vmul.f32 %v605_v34, %v596_v31  ;;  %v3129_v31 = vld [vmem:[#allocation7 + $0xa0] ss:$8 sps:$4 sm:$0xff]   ;;  %v3134_v32 = vld [vmem:[#allocation7 + $0xb4] ss:$8 sps:$4 sm:$0xff]  }
 0x12a   : > { %3249 = vpow2.f32 %v613_v33  ;;  %v3762_v13 = vpop.permute.xlu0 %1171 }
 0x12b   : > { %v615_v37 = vmul.f32 1.442695, %v609_v35  ;;  %v617_v38 = vmul.f32 1.442695, %v610_v36  ;;  %v1179_v18 = vadd.f32 %v3762_v13, %v1165_v15  ;;  %v3132_v35 = vld [vmem:[#allocation7 + $0xb0] ss:$8 sps:$4 sm:$0xff]  }
 0x12c   : > { %v627_v45 = vpop.permute.xlu1 %626  ;;  %v3137_v36 = vld [vmem:[#allocation7 + $0xc4] ss:$8 sps:$4 sm:$0xff]  }
 0x12d   : > { %3251 = vpow2.f32 %v615_v37  ;;  %v1183_v21 = vadd.f32 0.5, %v1179_v18 }
 0x12e   : > { %3253 = vpow2.f32 %v617_v38 }
 0x12f   : > { %v1187_v26 = vfloor.f32 %v1183_v21 }
 0x130   : > { %v3765_v16 = vpop.permute.xlu1 %1162 }
 0x131   : > { %v1167_v22 = vmul.f32 %v3765_v16, %v1148_v8  ;;  %v1191_v30 = vsub.f32 %v1179_v18, %v1187_v26  ;;  %v3486_v8 = vmov 2131351028   ;;  %v3487_v18 = vmov 683565275  }
 0x133   : > { %v3248_v39 = vpop.eup %3247  ;;  %v3772_v34 = vmul.f32 6.2831855, %v1191_v30 }
 0x134   : > { %v3250_v40 = vpop.eup %3249  ;;  %v629_v42 = vmul.f32 %v3248_v39, %v622_v41  ;;  %v3768_v10 = vpop.permute.xlu1 %1176  ;;  %v3135_v39 = vld [vmem:[#allocation7 + $0xc0] ss:$8 sps:$4 sm:$0xff]  }
 0x135   : > { %v630_v46 = vmul.f32 %v3250_v40, %v622_v41  ;;  %v1181_v25 = vadd.f32 %v3768_v10, %v1167_v22  ;;  %v1202_v38 = vand.u32 2139095040, %v3772_v34  ;;  %v3140_v40 = vld [vmem:[#allocation7 + $0xd4] ss:$8 sps:$4 sm:$0xff]  }
 0x136   : > { %v637_v54 = vmul.f32 %v633_v47, %v629_v42  ;;  %v3141_v47 = vld [vmem:[#allocation7 + $0xe0] ss:$8 sps:$4 sm:$0xff]  }
 0x137   : > { %v3252_v43 = vpop.eup %3251  ;;  %v638_v55 = vmul.f32 %v634_v50, %v630_v46  ;;  %v1185_v29 = vadd.f32 0.5, %v1181_v25  ;;  %v1203_v42 = vshrl.u32 %v1202_v38, 23 }
 0x138   : > { %v3254_v48 = vpop.eup %3253  ;;  %v631_v49 = vmul.f32 %v3252_v43, %v627_v45  ;;  %v3138_v43 = vld [vmem:[#allocation7 + $0xd0] ss:$8 sps:$4 sm:$0xff]  }
 0x139   : > { %v632_v52 = vmul.f32 %v3254_v48, %v627_v45  ;;  %v1189_v33 = vfloor.f32 %v1185_v29  ;;  %v2817_v46 = vadd.s32 4294967169, %v1203_v42  ;;  %v3146_v48 = vld [vmem:[#allocation7 + $0xf4] ss:$8 sps:$4 sm:$0xff]  }
 0x13a   : > { %v639_v53 = vmul.f32 %v635_v44, %v631_v49  ;;  %v3143_v44 = vld [vmem:[#allocation7 + $0xe4] ss:$8 sps:$4 sm:$0xff]  }
 0x13b   : > { %v640_v56 = vmul.f32 %v636_v51, %v632_v52  ;;  %v1193_v37 = vsub.f32 %v1181_v25, %v1189_v33  ;;  %v1209_v50 = vadd.s32 1, %v2817_v46  ;;  %v3144_v51 = vld [vmem:[#allocation7 + $0xf0] ss:$8 sps:$4 sm:$0xff]   ;;  %v3150_v46 = vld [vmem:[#allocation9 + $0x14] ss:$8 sps:$4 sm:$0xff]  }
 0x13c   : > { %v3749_v57 = vpack.c.bf16 %v639_v53, %v637_v54 }
 0x13d   : > { %v642_v58 = vpack.c.bf16 %v640_v56, %v638_v55  ;;  %v3775_v41 = vmul.f32 6.2831855, %v1193_v37  ;;  %vm1210_vm0 = vcmp.gt.s32.totalorder %v1209_v50, 0  ;;  %v3782_v56 = vrot.slane %v3755_v5, %v571_v11 }
 0x13e   : > { %v1211_v53 = vsel %vm1210_vm0, %v1209_v50, 0  ;;  %v1199_v11 = vand.u32 2147483647, %v3772_v34 }
 0x13f   : > { %875 = vmatprep.mubr.bf16.mxu1 %v642_v58  ;;  %v1408_v45 = vand.u32 2139095040, %v3775_v41  ;;  %v1213_v55 = vand.u32 31, %v1211_v53 }
 0x140   : > { %876 = vmatmul.mubr.bf16.vlgmr.msra.gmra.mrb[0].mxu1 %v3749_v57 }
 0x141   : > { %1079 = vmatpush1.bf16.msra.mxu1 %v3099_v59  ;;  %1110 = vmatprep.mubr.bf16.mxu1 %v642_v58  ;;  %v1409_v49 = vshrl.u32 %v1408_v45, 23  ;;  %v3784_v58 = vsub.s32 32, %v1213_v55  ;;  %v3149_v45 = vld [vmem:[#allocation9] ss:$8 sps:$4 sm:$0xff]  }
 0x142   : > { %1080 = vmatprep.subr.bf16.mxu1 %v3104_v60 }
 0x143   : > { %v2825_v52 = vadd.s32 4294967169, %v1409_v49 }
 0x145   : > { %1081 = vmatpush1.bf16.msra.mxu1 %v3102_v61  ;;  %v1415_v54 = vadd.s32 1, %v2825_v52  ;;  %v1166_v61 = vmul.f32 %v3757_v6, %v3782_v56  ;;  %v3485_v6 = vmov 2475754826  }
 0x146   : > { %1082 = vmatprep.subr.bf16.mxu1 %v3107_v62  ;;  %v3482_v62 = vmov 920167782  }
 0x147   : > { %vm1416_vm1 = vcmp.gt.s32.totalorder %v1415_v54, 0 }
 0x148   : > { %v1417_v59 = vsel %vm1416_vm1, %v1415_v54, 0 }
 0x149   : > { %1083 = vmatpush1.bf16.msra.mxu1 %v3105_v63  ;;  %v1419_v60 = vand.u32 31, %v1417_v59  ;;  %v1226_v63 = vshrl.u32 %v3482_v62, %v3784_v58 }
 0x14a   : > { %1084 = vmatprep.subr.bf16.mxu1 %v3110_v0  ;;  %v3483_v0 = vmov 2102212464  }
 0x14b   : > { %v1225_v9 = vshll.u32 %v3483_v0, %v1213_v55  ;;  %v1431_v29 = vshll.u32 %v3483_v0, %v1419_v60  ;;  %v1434_v30 = vshll.u32 %v3482_v62, %v1419_v60  ;;  %v1425_v42 = vshll.u32 %v3485_v6, %v1419_v60 }
 0x14d   : > { %1085 = vmatpush1.bf16.msra.mxu1 %v3108_v1  ;;  %v3795_v1 = vshrl.u32 %v1211_v53, 5  ;;  %v1227_v5 = vor.u32 %v1226_v63, %v1225_v9  ;;  %v1168_v63 = vmul.f32 %v3765_v16, %v3782_v56 }
 0x14e   : > { %1086 = vmatprep.subr.bf16.mxu1 %v3113_v2  ;;  %v3484_v2 = vmov 1326507024  }
 0x14f   : > { %vm1234_vm2 = vcmp.lt.s32.totalorder %v3795_v1, 4  ;;  %vm1231_vm3 = vcmp.lt.s32.totalorder %v3795_v1, 1  ;;  %vm1233_vm4 = vcmp.lt.s32.totalorder %v3795_v1, 3  ;;  %vm1232_vm6 = vcmp.lt.s32.totalorder %v3795_v1, 2 }
 0x151   : > { %1087 = vmatpush1.bf16.msra.mxu1 %v3111_v3  ;;  %v1229_v3 = vshrl.u32 %v3484_v2, %v3784_v58 }
 0x152   : > { %1088 = vmatprep.subr.bf16.mxu1 %v3116_v4  ;;  %v3799_v4 = vsub.s32 32, %v1419_v60 }
 0x154   : > { %v1432_v22 = vshrl.u32 %v3482_v62, %v3799_v4  ;;  %v1435_v25 = vshrl.u32 %v3484_v2, %v3799_v4  ;;  %v1423_v33 = vshrl.u32 %v3485_v6, %v3799_v4 }
 0x155   : > { %1089 = vmatpush1.bf16.msra.mxu1 %v3114_v7  ;;  %v1217_v7 = vshrl.u32 %v3485_v6, %v3784_v58 }
 0x156   : > { %1090 = vmatprep.subr.bf16.mxu1 %v3119_v12  ;;  %v1220_v12 = vshrl.u32 %v3486_v8, %v3784_v58  ;;  %v1433_v38 = vor.u32 %v1432_v22, %v1431_v29  ;;  %v3156_v22 = vld [vmem:[#allocation9 + $0x34] ss:$8 sps:$4 sm:$0xff]  }
 0x159   : > { %1091 = vmatpush1.bf16.msra.mxu1 %v3117_v14  ;;  %v1223_v14 = vshrl.u32 %v3483_v0, %v3784_v58 }
 0x15a   : > { %1092 = vmatprep.subr.bf16.mxu1 %v3122_v17  ;;  %v1206_v17 = vand.u32 8388607, %v1199_v11 }
 0x15d   : > { %1093 = vmatpush1.bf16.msra.mxu1 %v3120_v19  ;;  %v1216_v19 = vshll.u32 %v3487_v18, %v1213_v55 }
 0x15e   : > { %1094 = vmatprep.subr.bf16.mxu1 %v3125_v20  ;;  %v1219_v20 = vshll.u32 %v3485_v6, %v1213_v55 }
 0x15f   : > { %v3823_v26 = vor.u32 %v1217_v7, %v1216_v19  ;;  %v3155_v19 = vld [vmem:[#allocation9 + $0x20] ss:$8 sps:$4 sm:$0xff]  }
 0x161   : > { %1095 = vmatpush1.bf16.msra.mxu1 %v3123_v23  ;;  %v1222_v23 = vshll.u32 %v3486_v8, %v1213_v55 }
 0x162   : > { %1096 = vmatprep.subr.bf16.mxu1 %v3128_v24  ;;  %v1240_v24 = vsel %vm1234_vm2, %v1227_v5, 920167782 }
 0x165   : > { %1097 = vmatpush1.bf16.msra.mxu1 %v3126_v27  ;;  %v3825_v27 = vor.u32 %v1220_v12, %v1219_v20 }
 0x166   : > { %1098 = vmatprep.subr.bf16.mxu1 %v3131_v28  ;;  %v3827_v28 = vshrl.u32 %v1417_v59, 5 }
 0x168   : > { %vm1440_vm5 = vcmp.lt.s32.totalorder %v3827_v28, 4  ;;  %vm1437_vm7 = vcmp.lt.s32.totalorder %v3827_v28, 1  ;;  %vm1439_vm8 = vcmp.lt.s32.totalorder %v3827_v28, 3  ;;  %vm1438_vm9 = vcmp.lt.s32.totalorder %v3827_v28, 2  ;;  %v3171_v28 = vld [vmem:[#allocation9 + $0x84] ss:$8 sps:$4 sm:$0xff]  }
 0x169   : > { %1099 = vmatpush1.bf16.msra.mxu1 %v3129_v31  ;;  %v1224_v31 = vor.u32 %v1223_v14, %v1222_v23  ;;  %v1446_v54 = vsel %vm1440_vm5, %v1433_v38, 920167782  ;;  %v1182_v14 = vadd.f32 %v3768_v10, %v1168_v63 }
 0x16a   : > { %1100 = vmatprep.subr.bf16.mxu1 %v3134_v32  ;;  %v1405_v32 = vand.u32 2147483647, %v3775_v41 }
 0x16b   : > { %v1241_v49 = vsel %vm1233_vm4, %v1224_v31, %v1240_v24 }
 0x16c   : > { %v1412_v50 = vand.u32 8388607, %v1405_v32 }
 0x16d   : > { %1101 = vmatpush1.bf16.msra.mxu1 %v3132_v35  ;;  %v1426_v35 = vshrl.u32 %v3486_v8, %v3799_v4 }
 0x16e   : > { %1102 = vmatprep.subr.bf16.mxu1 %v3137_v36  ;;  %v1429_v36 = vshrl.u32 %v3483_v0, %v3799_v4  ;;  %v1413_v16 = vor.u32 8388608, %v1412_v50 }
 0x16f   : > { %v3856_v52 = vor.u32 %v1426_v35, %v1425_v42  ;;  %v3158_v35 = vld [vmem:[#allocation9 + $0x30] ss:$8 sps:$4 sm:$0xff]  }
 0x171   : > { %1103 = vmatpush1.bf16.msra.mxu1 %v3135_v39  ;;  %v1436_v39 = vor.u32 %v1435_v25, %v1434_v30  ;;  %v1453_v30 = vshll.u32 %v1413_v16, 8 }
 0x172   : > { %1104 = vmatprep.subr.bf16.mxu1 %v3140_v40  ;;  %v1422_v40 = vshll.u32 %v3487_v18, %v1419_v60 }
 0x173   : > { %v1450_v9 = vsel %vm1440_vm5, %v1436_v39, 1326507024 }
 0x175   : > { %1105 = vmatpush1.bf16.msra.mxu1 %v3138_v43  ;;  %v1428_v43 = vshll.u32 %v3486_v8, %v1419_v60  ;;  %v3152_v60 = vld [vmem:[#allocation9 + $0x10] ss:$8 sps:$4 sm:$0xff]  }
 0x176   : > { %1106 = vmatprep.subr.bf16.mxu1 %v3143_v44  ;;  %v3147_v44 = vld [vmem:[#allocation9 + $0x4] ss:$8 sps:$4 sm:$0xff]  }
 0x177   : > { %v1430_v53 = vor.u32 %v1429_v36, %v1428_v43  ;;  %2249 = vmatprep.subr.bf16.mxu0 %v3147_v44  ;;  %v1236_v36 = vsel %vm1234_vm2, %v1224_v31, 2102212464 }
 0x178   : > { %2250 = vmatpush1.bf16.msra.mxu0 %v3149_v45 }
 0x179   : > { %1107 = vmatpush1.bf16.msra.mxu1 %v3141_v47  ;;  %v1207_v47 = vor.u32 8388608, %v1206_v17  ;;  %2251 = vmatprep.subr.bf16.mxu0 %v3150_v46  ;;  %v1451_v17 = vsel %vm1439_vm8, %v1433_v38, %v1450_v9  ;;  %v3161_v46 = vld [vmem:[#allocation9 + $0x40] ss:$8 sps:$4 sm:$0xff]  }
 0x17a   : > { %1108 = vmatprep.subr.bf16.mxu1 %v3146_v48  ;;  %v1239_v48 = vsel %vm1231_vm3, %v3823_v26, %v3825_v27  ;;  %v3167_v9 = vld [vmem:[#allocation9 + $0x60] ss:$8 sps:$4 sm:$0xff]  }
 0x17b   : > { %v1242_v7 = vsel %vm1232_vm6, %v1239_v48, %v1241_v49  ;;  %v3873_v12 = vshll.u32 %v1207_v47, 8  ;;  %v1442_v48 = vsel %vm1440_vm5, %v1430_v53, 2102212464 }
 0x17c   : > { %2252 = vmatpush1.bf16.msra.mxu0 %v3152_v60 }
 0x17d   : > { %1109 = vmatpush1.bf16.msra.mxu1 %v3144_v51  ;;  %v3854_v51 = vor.u32 %v1423_v33, %v1422_v40  ;;  %v1186_v33 = vadd.f32 0.5, %v1182_v14  ;;  %v1215_v40 = vshrl.u32 %v3487_v18, %v3784_v58  ;;  %v3162_v58 = vld [vmem:[#allocation9 + $0x54] ss:$8 sps:$4 sm:$0xff]  }
 0x17f   : > { %v1445_v56 = vsel %vm1437_vm7, %v3854_v51, %v3856_v52  ;;  %v1190_v44 = vfloor.f32 %v1186_v33  ;;  %v1235_v45 = vsel %vm1231_vm3, %v1215_v40, %v3823_v26  ;;  %v1421_v26 = vshrl.u32 %v3487_v18, %v3799_v4  ;;  %v3165_v4 = vld [vmem:[#allocation9 + $0x64] ss:$8 sps:$4 sm:$0xff]  }
 0x180   : > { %1111 = vmatmul.mubr.bf16.vlgmr.msra.gmra.mrb[4].mxu1 %v3749_v57  ;;  %v3791_v57 = vadd.f32 %v3762_v13, %v1166_v61  ;;  %v1228_v13 = vshll.u32 %v3482_v62, %v1213_v55  ;;  %v1243_v55 = vsel %vm1231_vm3, %v3825_v27, %v1224_v31  ;;  %v1237_v31 = vsel %vm1233_vm4, %v3825_v27, %v1236_v36 }
 0x181   : > { %v1238_v27 = vsel %vm1232_vm6, %v1235_v45, %v1237_v31  ;;  %v1194_v50 = vsub.f32 %v1182_v14, %v1190_v44  ;;  %v3170_v14 = vld [vmem:[#allocation9 + $0x70] ss:$8 sps:$4 sm:$0xff]   ;;  %v3180_v44 = vld [vmem:[#allocation9 + $0xb4] ss:$8 sps:$4 sm:$0xff]  }
 0x182   : > { %v3809_v15 = vadd.f32 0.5, %v3791_v57  ;;  %v1230_v21 = vor.u32 %v1229_v3, %v1228_v13  ;;  %v3153_v3 = vld [vmem:[#allocation9 + $0x24] ss:$8 sps:$4 sm:$0xff]   ;;  %v1447_v13 = vsel %vm1439_vm8, %v1430_v53, %v1446_v54  ;;  %v1441_v54 = vsel %vm1437_vm7, %v1421_v26, %v3854_v51 }
 0x183   : > { %2253 = vmatprep.subr.bf16.mxu0 %v3153_v3  ;;  %v1448_v25 = vsel %vm1438_vm9, %v1445_v56, %v1447_v13  ;;  %v1254_v1 = vmul.u32 %v3873_v12, %v1238_v27  ;;  %v3948_v63 = vmul.f32 6.2831855, %v1194_v50  ;;  %v3185_v50 = vld [vmem:[#allocation9 + $0xc0] ss:$8 sps:$4 sm:$0xff]  }
 0x184   : > { %v1244_v37 = vsel %vm1234_vm2, %v1230_v21, 1326507024  ;;  %v1188_v61 = vfloor.f32 %v3809_v15  ;;  %v1449_v15 = vsel %vm1437_vm7, %v3856_v52, %v1430_v53  ;;  %2254 = vmatpush1.bf16.msra.mxu0 %v3155_v19  ;;  %v1443_v53 = vsel %vm1439_vm8, %v3856_v52, %v1442_v48  ;;  %v3183_v48 = vld [vmem:[#allocation9 + $0xc4] ss:$8 sps:$4 sm:$0xff]  }
 0x185   : > { %v1245_v59 = vsel %vm1233_vm4, %v1227_v5, %v1244_v37  ;;  %v3892_v20 = vmul.u32.u64.low %v3873_v12, %v1242_v7  ;;  %v3893_v21 = vmul.u32.u64.high %v3873_v12, %v1242_v7, %v3892_v20  ;;  %v1452_v29 = vsel %vm1438_vm9, %v1449_v15, %v1451_v17  ;;  %2255 = vmatprep.subr.bf16.mxu0 %v3156_v22  ;;  %v3168_v7 = vld [vmem:[#allocation9 + $0x74] ss:$8 sps:$4 sm:$0xff]   ;;  %v3173_v22 = vld [vmem:[#allocation9 + $0x80] ss:$8 sps:$4 sm:$0xff]  }
 0x186   : > { %v1246_v5 = vsel %vm1232_vm6, %v1243_v55, %v1245_v59  ;;  %v1192_v10 = vsub.f32 %v3791_v57, %v1188_v61  ;;  %v3908_v37 = vmul.u32.u64.low %v1453_v30, %v1448_v25  ;;  %v3909_v38 = vmul.u32.u64.high %v1453_v30, %v1448_v25, %v3908_v37  ;;  %v3159_v57 = vld [vmem:[#allocation9 + $0x44] ss:$8 sps:$4 sm:$0xff]   ;;  %v3164_v55 = vld [vmem:[#allocation9 + $0x50] ss:$8 sps:$4 sm:$0xff]  }
 0x187   : > { %v3899_v23 = vmul.u32.u64.low %v3873_v12, %v1246_v5  ;;  %v3900_v24 = vmul.u32.u64.high %v3873_v12, %v1246_v5, %v3899_v23  ;;  %v3916_v42 = vmul.u32.u64.low %v1453_v30, %v1452_v29  ;;  %v3917_v43 = vmul.u32.u64.high %v1453_v30, %v1452_v29, %v3916_v42 }
 0x188   : > { %v3912_v39 = vmul.f32 6.2831855, %v1192_v10  ;;  %2256 = vmatpush1.bf16.msra.mxu0 %v3158_v35  ;;  %v1257_v47 = vadd.s32 1, %v3893_v21  ;;  %v1463_v60 = vadd.s32 1, %v3909_v38  ;;  %v1444_v51 = vsel %vm1438_vm9, %v1441_v54, %v1443_v53  ;;  %v3174_v10 = vld [vmem:[#allocation9 + $0x94] ss:$8 sps:$4 sm:$0xff]  }
 0x189   : > { %2257 = vmatprep.subr.bf16.mxu0 %v3159_v57  ;;  %vm1256_vm10 = vc.u32 %v3900_v24, %v3892_v20  ;;  %vm1462_vm11 = vc.u32 %v3917_v43, %v3908_v37  ;;  %v1460_v16 = vmul.u32 %v1453_v30, %v1444_v51  ;;  %v1511_v56 = vand.u32 2139095040, %v3948_v63  ;;  %v3176_v30 = vld [vmem:[#allocation9 + $0x90] ss:$8 sps:$4 sm:$0xff]   ;;  %v3177_v35 = vld [vmem:[#allocation9 + $0xa4] ss:$8 sps:$4 sm:$0xff]  }
 0x18a   : > { %v1305_v49 = vand.u32 2139095040, %v3912_v39  ;;  %v1258_v59 = vsel %vm1256_vm10, %v1257_v47, %v3893_v21  ;;  %v1464_v3 = vsel %vm1462_vm11, %v1463_v60, %v3909_v38  ;;  %v3179_v42 = vld [vmem:[#allocation9 + $0xa0] ss:$8 sps:$4 sm:$0xff]   ;;  %v3182_v47 = vld [vmem:[#allocation9 + $0xb0] ss:$8 sps:$4 sm:$0xff]   ;;  %vm1201_vm10 = vcmp.lt.s32.totalorder %v3772_v34, 0 }
 0x18b   : > { %v1259_v52 = vadd.s32 %v1258_v59, %v1254_v1  ;;  %v1465_v13 = vadd.s32 %v1464_v3, %v1460_v16  ;;  %v1512_v17 = vshrl.u32 %v1511_v56, 23  ;;  %v3186_v53 = vld [vmem:[#allocation9 + $0xd4] ss:$8 sps:$4 sm:$0xff]   ;;  %v1302_v60 = vand.u32 2147483647, %v3912_v39 }
 0x18c   : > { %2258 = vmatpush1.bf16.msra.mxu0 %v3161_v46  ;;  %v1306_v61 = vshrl.u32 %v1305_v49, 23  ;;  %vm1407_vm11 = vcmp.lt.s32.totalorder %v3775_v41, 0 }
 0x18d   : > { %2259 = vmatprep.subr.bf16.mxu0 %v3162_v58  ;;  %v1260_v12 = vadd.s32 536870912, %v1259_v52  ;;  %v1466_v21 = vadd.s32 536870912, %v1465_v13  ;;  %v2829_v23 = vadd.s32 4294967169, %v1512_v17 }
 0x18e   : > { %v2821_v5 = vadd.s32 4294967169, %v1306_v61 }
 0x18f   : > { %v3952_v19 = vshrl.u32 %v1260_v12, 30  ;;  %v3955_v29 = vshrl.u32 %v1466_v21, 30  ;;  %v1518_v38 = vadd.s32 1, %v2829_v23 }
 0x190   : > { %2260 = vmatpush1.bf16.msra.mxu0 %v3164_v55  ;;  %v1312_v15 = vadd.s32 1, %v2821_v5  ;;  %v1309_v5 = vand.u32 8388607, %v1302_v60 }
 0x191   : > { %2261 = vmatprep.subr.bf16.mxu0 %v3165_v4  ;;  %v1262_v25 = vshll.u32 %v3952_v19, 30  ;;  %v1468_v40 = vshll.u32 %v3955_v29, 30  ;;  %vm1519_vm13 = vcmp.gt.s32.totalorder %v1518_v38, 0 }
 0x192   : > { %vm1313_vm12 = vcmp.gt.s32.totalorder %v1312_v15, 0  ;;  %v1520_v58 = vsel %vm1519_vm13, %v1518_v38, 0  ;;  %vm1406_vm13 = vcmp.le.f32.partialorder %v1405_v32, 0.7853982 }
 0x193   : > { %v1314_v33 = vsel %vm1313_vm12, %v1312_v15, 0  ;;  %v3957_v57 = vsub.s32 %v1259_v52, %v1262_v25  ;;  %v3963_v46 = vsub.s32 %v1465_v13, %v1468_v40  ;;  %v1522_v59 = vand.u32 31, %v1520_v58 }
 0x194   : > { %2262 = vmatpush1.bf16.msra.mxu0 %v3167_v9  ;;  %v1316_v36 = vand.u32 31, %v1314_v33  ;;  %v3973_v4 = vshrl.u32 %v1314_v33, 5  ;;  %v3188_v9 = vld [vmem:[#allocation9 + $0xd0] ss:$8 sps:$4 sm:$0xff]   ;;  %v3990_v15 = vshrl.u32 %v1520_v58, 5 }
 0x195   : > { %2263 = vmatprep.subr.bf16.mxu0 %v3168_v7  ;;  %v1265_v31 = vsub.s32 0, %v3957_v57  ;;  %v1471_v27 = vsub.s32 0, %v3963_v46  ;;  %v3977_v7 = vsub.s32 32, %v1522_v59  ;;  %v1508_v40 = vand.u32 2147483647, %v3948_v63 }
 0x196   : > { %v3960_v45 = vsub.s32 32, %v1316_v36  ;;  %v1328_v55 = vshll.u32 %v3483_v0, %v1316_v36  ;;  %v1331_v61 = vshll.u32 %v3482_v62, %v1316_v36  ;;  %vm1337_vm14 = vcmp.lt.s32.totalorder %v3973_v4, 4 }
 0x197   : > { %v2818_v26 = vmin.u32 %v1265_v31, %v3957_v57  ;;  %v2826_v52 = vmin.u32 %v1471_v27, %v3963_v46  ;;  %v1322_v17 = vshll.u32 %v3485_v6, %v1316_v36  ;;  %v1325_v21 = vshll.u32 %v3486_v8, %v1316_v36 }
 0x198   : > { %2264 = vmatpush1.bf16.msra.mxu0 %v3170_v14  ;;  %v1329_v49 = vshrl.u32 %v3482_v62, %v3960_v45  ;;  %v1332_v54 = vshrl.u32 %v3484_v2, %v3960_v45  ;;  %v1323_v16 = vshrl.u32 %v3486_v8, %v3960_v45  ;;  %v1326_v56 = vshrl.u32 %v3483_v0, %v3960_v45 }
 0x199   : > { %2265 = vmatprep.subr.bf16.mxu0 %v3171_v28  ;;  %v1267_v51 = vclz %v2818_v26  ;;  %v1473_v14 = vclz %v2826_v52  ;;  %v1320_v23 = vshrl.u32 %v3485_v6, %v3960_v45  ;;  %v1535_v25 = vshrl.u32 %v3482_v62, %v3977_v7 }
 0x19a   : > { %v1330_v1 = vor.u32 %v1329_v49, %v1328_v55  ;;  %v1333_v3 = vor.u32 %v1332_v54, %v1331_v61  ;;  %v4001_v33 = vor.u32 %v1326_v56, %v1325_v21  ;;  %vm1336_vm15 = vcmp.lt.s32.totalorder %v3973_v4, 3  ;;  %v3189_v56 = vld [vmem:[#allocation9 + $0xe4] ss:$8 sps:$4 sm:$0xff]  }
 0x19b   : > { %v2819_v13 = vadd.s32 4294967294, %v1267_v51  ;;  %v2827_v38 = vadd.s32 4294967294, %v1473_v14  ;;  %v1532_v31 = vshrl.u32 %v3483_v0, %v3977_v7  ;;  %vm1334_vm1 = vcmp.lt.s32.totalorder %v3973_v4, 1  ;;  %v3191_v14 = vld [vmem:[#allocation9 + $0xe0] ss:$8 sps:$4 sm:$0xff]  }
 0x19c   : > { %2266 = vmatpush1.bf16.msra.mxu0 %v3173_v22  ;;  %v1343_v12 = vsel %vm1337_vm14, %v1330_v1, 920167782  ;;  %v1347_v28 = vsel %vm1337_vm14, %v1333_v3, 1326507024  ;;  %v1310_v22 = vor.u32 8388608, %v1309_v5  ;;  %v1525_v49 = vshll.u32 %v3487_v18, %v1522_v59 }
 0x19d   : > { %2267 = vmatprep.subr.bf16.mxu0 %v3174_v10  ;;  %v1319_v10 = vshll.u32 %v3487_v18, %v1316_v36  ;;  %vm2820_vm0 = vcmp.lt.s32.totalorder %v2819_v13, 0  ;;  %v1534_v36 = vshll.u32 %v3483_v0, %v1522_v59  ;;  %v1528_v26 = vshll.u32 %v3485_v6, %v1522_v59 }
 0x19e   : > { %v1531_v27 = vshll.u32 %v3486_v8, %v1522_v59  ;;  %v4024_v54 = vsel %vm2820_vm0, 0, %v2819_v13  ;;  %vm2828_vm2 = vcmp.lt.s32.totalorder %v2827_v38, 0  ;;  %v1515_v0 = vand.u32 8388607, %v1508_v40 }
 0x19f   : > { %v1536_v58 = vor.u32 %v1535_v25, %v1534_v36  ;;  %vm1543_vm3 = vcmp.lt.s32.totalorder %v3990_v15, 4  ;;  %vm1335_vm4 = vcmp.lt.s32.totalorder %v3973_v4, 2  ;;  %v4049_v51 = vshll.u32 %v1310_v22, 8 }
 0x1a0   : > { %2268 = vmatpush1.bf16.msra.mxu0 %v3176_v30  ;;  %v3999_v30 = vor.u32 %v1323_v16, %v1322_v17  ;;  %v4051_v52 = vsel %vm2828_vm2, 0, %v2827_v38  ;;  %v1275_v3 = vsub.s32 4294967266, %v4024_v54  ;;  %v1516_v5 = vor.u32 8388608, %v1515_v0 }
 0x1a1   : > { %2269 = vmatprep.subr.bf16.mxu0 %v3177_v35  ;;  %v1538_v35 = vshrl.u32 %v3484_v2, %v3977_v7  ;;  %v1348_v2 = vsel %vm1336_vm15, %v1330_v1, %v1347_v28  ;;  %v1549_v61 = vsel %vm1543_vm3, %v1536_v58, 920167782  ;;  %vm1540_vm5 = vcmp.lt.s32.totalorder %v3990_v15, 1  ;;  %v3192_v28 = vld [vmem:[#allocation9 + $0xf4] ss:$8 sps:$4 sm:$0xff]  }
 0x1a2   : > { %vm1542_vm6 = vcmp.lt.s32.totalorder %v3990_v15, 3  ;;  %v1481_v17 = vsub.s32 4294967266, %v4051_v52  ;;  %vm1541_vm7 = vcmp.lt.s32.totalorder %v3990_v15, 2  ;;  %v1276_v25 = vadd.s32 127, %v1275_v3 }
 0x1a3   : > { %vm4145_vm12 = vcmp.le.f32.partialorder %v1199_v11, 0.7853982 }
 0x1a4   : > { %2270 = vmatpush1.bf16.msra.mxu0 %v3179_v42  ;;  %v1526_v42 = vshrl.u32 %v3485_v6, %v3977_v7  ;;  %v1533_v6 = vor.u32 %v1532_v31, %v1531_v27 }
 0x1a5   : > { %2271 = vmatprep.subr.bf16.mxu0 %v3180_v44  ;;  %v1529_v44 = vshrl.u32 %v3486_v8, %v3977_v7 }
 0x1a6   : > { %v1550_v13 = vsel %vm1542_vm6, %v1533_v6, %v1549_v61  ;;  %v1318_v61 = vshrl.u32 %v3487_v18, %v3960_v45 }
 0x1a7   : > { %v4034_v55 = vor.u32 %v1529_v44, %v1528_v26  ;;  %v1271_v44 = vsub.s32 32, %v4024_v54 }
 0x1a8   : > { %2272 = vmatpush1.bf16.msra.mxu0 %v3182_v47  ;;  %v1537_v47 = vshll.u32 %v3482_v62, %v1522_v59  ;;  %v1346_v62 = vsel %vm1334_vm1, %v3999_v30, %v4001_v33  ;;  %v1344_v59 = vsel %vm1336_vm15, %v4001_v33, %v1343_v12 }
 0x1a9   : > { %2273 = vmatprep.subr.bf16.mxu0 %v3183_v48  ;;  %v4015_v48 = vor.u32 %v1320_v23, %v1319_v10  ;;  %v1349_v1 = vsel %vm1335_vm4, %v1346_v62, %v1348_v2  ;;  %v1552_v21 = vsel %vm1540_vm5, %v4034_v55, %v1533_v6  ;;  %v3197_v2 = vld [vmem:[#allocation10 + $0x4] ss:$8 sps:$4 sm:$0xff]   ;;  %v1477_v62 = vsub.s32 32, %v4051_v52 }
 0x1aa   : > { %v4073_v10 = vmul.u32.u64.low %v4049_v51, %v1349_v1  ;;  %v4074_v23 = vmul.u32.u64.high %v4049_v51, %v1349_v1, %v4073_v10  ;;  %v1339_v1 = vsel %vm1337_vm14, %v4001_v33, 2102212464 }
 0x1ab   : > { %v1342_v8 = vsel %vm1334_vm1, %v4015_v48, %v3999_v30  ;;  %v1338_v3 = vsel %vm1334_vm1, %v1318_v61, %v4015_v48  ;;  %v1340_v33 = vsel %vm1336_vm15, %v3999_v30, %v1339_v1  ;;  %v1478_v48 = vshll.u32 %v3963_v46, %v4051_v52 }
 0x1ac   : > { %2274 = vmatpush1.bf16.msra.mxu0 %v3185_v50  ;;  %v1539_v50 = vor.u32 %v1538_v35, %v1537_v47  ;;  %v1345_v16 = vsel %vm1335_vm4, %v1342_v8, %v1344_v59  ;;  %v1556_v47 = vshll.u32 %v1516_v5, 8  ;;  %v1545_v5 = vsel %vm1543_vm3, %v1533_v6, 2102212464 }
 0x1ad   : > { %2275 = vmatprep.subr.bf16.mxu0 %v3186_v53  ;;  %v4032_v53 = vor.u32 %v1526_v42, %v1525_v49  ;;  %v4078_v35 = vmul.u32.u64.low %v4049_v51, %v1345_v16  ;;  %v4079_v38 = vmul.u32.u64.high %v4049_v51, %v1345_v16, %v4078_v35  ;;  %v3194_v42 = vld [vmem:[#allocation9 + $0xf0] ss:$8 sps:$4 sm:$0xff]   ;;  %v1255_v49 = vadd.s32 %v3892_v20, %v3900_v24 }
 0x1ae   : > { %v1461_v20 = vadd.s32 %v3908_v37, %v3917_v43  ;;  %v1524_v37 = vshrl.u32 %v3487_v18, %v3977_v7  ;;  %v1546_v30 = vsel %vm1542_vm6, %v4034_v55, %v1545_v5  ;;  %v1341_v18 = vsel %vm1335_vm4, %v1338_v3, %v1340_v33 }
 0x1af   : > { %v1548_v12 = vsel %vm1540_vm5, %v4032_v53, %v4034_v55  ;;  %v1273_v59 = vshrl.u32 %v1255_v49, %v1271_v44  ;;  %vm1359_vm8 = vc.u32 %v4074_v23, %v4078_v35  ;;  %v1285_v49 = vsub.s32 4, %v3952_v19 }
 0x1b0   : > { %2276 = vmatpush1.bf16.msra.mxu0 %v3188_v9  ;;  %v1553_v9 = vsel %vm1543_vm3, %v1539_v50, 1326507024  ;;  %v1551_v36 = vsel %vm1541_vm7, %v1548_v12, %v1550_v13  ;;  %v1277_v50 = vshll.u32 %v1276_v25, 23  ;;  %v1479_v16 = vshrl.u32 %v1461_v20, %v1477_v62 }
 0x1b1   : > { %v1554_v22 = vsel %vm1542_vm6, %v1536_v58, %v1553_v9  ;;  %2277 = vmatprep.subr.bf16.mxu0 %v3189_v56  ;;  %v1482_v58 = vadd.s32 127, %v1481_v17  ;;  %v4089_v26 = vmul.u32.u64.low %v1556_v47, %v1551_v36  ;;  %v4090_v27 = vmul.u32.u64.high %v1556_v47, %v1551_v36, %v4089_v26 }
 0x1b2   : > { %v1555_v31 = vsel %vm1541_vm7, %v1552_v21, %v1554_v22  ;;  %v1272_v9 = vshll.u32 %v3957_v57, %v4024_v54  ;;  %v1278_v45 = vor.u32 4788187, %v1277_v50  ;;  %v1360_v57 = vadd.s32 1, %v4079_v38 }
 0x1b3   : > { %v4094_v0 = vmul.u32.u64.low %v1556_v47, %v1555_v31  ;;  %v4095_v8 = vmul.u32.u64.high %v1556_v47, %v1555_v31, %v4094_v0  ;;  %v1483_v24 = vshll.u32 %v1482_v58, 23  ;;  %v1544_v6 = vsel %vm1540_vm5, %v1524_v37, %v4032_v53 }
 0x1b4   : > { %2278 = vmatpush1.bf16.msra.mxu0 %v3191_v14  ;;  %v1274_v43 = vor.u32 %v1273_v59, %v1272_v9  ;;  %v1566_v7 = vadd.s32 1, %v4090_v27  ;;  %v1279_v56 = vand.u32 2147483647, %v1278_v45  ;;  %v1480_v12 = vor.u32 %v1479_v16, %v1478_v48 }
 0x1b5   : > { %2279 = vmatprep.subr.bf16.mxu0 %v3192_v28  ;;  %v1484_v54 = vor.u32 4788187, %v1483_v24  ;;  %vm1565_vm9 = vc.u32 %v4095_v8, %v4089_v26  ;;  %v1361_v46 = vsel %vm1359_vm8, %v1360_v57, %v4079_v38  ;;  %v1547_v52 = vsel %vm1541_vm7, %v1544_v6, %v1546_v30 }
 0x1b6   : > { %v1281_v53 = vcvt.s32.f32 %v1274_v43  ;;  %v1357_v13 = vmul.u32 %v4049_v51, %v1341_v18  ;;  %v1567_v55 = vsel %vm1565_vm9, %v1566_v7, %v4090_v27  ;;  %v1487_v17 = vcvt.s32.f32 %v1480_v12 }
 0x1b7   : > { %v1485_v14 = vand.u32 2147483647, %v1484_v54  ;;  %v1563_v21 = vmul.u32 %v1556_v47, %v1547_v52  ;;  %v1491_v50 = vsub.s32 4, %v3955_v29  ;;  %v1286_v0 = vsel %vm1201_vm10, %v1285_v49, %v3952_v19 }
 0x1b8   : > { %2280 = vmatpush1.bf16.msra.mxu0 %v3194_v42  ;;  %v1282_v4 = vmul.f32 %v1281_v53, %v1279_v56  ;;  %v1362_v28 = vadd.s32 %v1361_v46, %v1357_v13  ;;  %v4175_v61 = vsel %vm4145_vm12, 0, %v1286_v0  ;;  %vm1291_vm5 = vweird.f32 %v3772_v34 }
 0x1b9   : > { %2498 = vmatprep.subr.bf16.mxu0 %v3197_v2  ;;  %v1488_v22 = vmul.f32 %v1487_v17, %v1485_v14  ;;  %v1568_v10 = vadd.s32 %v1567_v55, %v1563_v21  ;;  %v1492_v32 = vsel %vm1407_vm11, %v1491_v50, %v3955_v29  ;;  %v1704_v9 = vadd.s32 3, %v4175_v61 }
 0x1ba   : > { %v1283_v25 = vxor.u32 2147483648, %v1282_v4  ;;  %v1363_v36 = vadd.s32 536870912, %v1362_v28  ;;  %v4178_v20 = vsel %vm1406_vm13, 0, %v1492_v32  ;;  %vm1497_vm7 = vweird.f32 %v3775_v41 }
 0x1bb   : > { %v1489_v42 = vxor.u32 2147483648, %v1488_v22  ;;  %v1569_v44 = vadd.s32 536870912, %v1568_v10  ;;  %v1912_v29 = vadd.s32 3, %v4178_v20  ;;  %v1705_v37 = vand.u32 3, %v1704_v9 }
 0x1bc   : > { %v1284_v15 = vsel %vm1201_vm10, %v1283_v25, %v1282_v4  ;;  %v4140_v38 = vshrl.u32 %v1363_v36, 30  ;;  %v1564_v50 = vadd.s32 %v4089_v26, %v4095_v8  ;;  %vm1304_vm8 = vcmp.lt.s32.totalorder %v3912_v39, 0 }
 0x1bd   : > { %v1490_v31 = vsel %vm1407_vm11, %v1489_v42, %v1488_v22  ;;  %v4151_v47 = vshrl.u32 %v1569_v44, 30  ;;  %v1287_v2 = vsel %vm4145_vm12, %v3772_v34, %v1284_v15  ;;  %v1913_v54 = vand.u32 3, %v1912_v29 }
 0x1be   : > { %v1365_v58 = vshll.u32 %v4140_v38, 30  ;;  %v1493_v11 = vsel %vm1406_vm13, %v3775_v41, %v1490_v31  ;;  %3255 = vcosq.f32 %v1287_v2  ;;  %vm1707_vm14 = vcmp.eq.s32.totalorder %v1705_v37, 0 }
 0x1bf   : > { %v1571_v27 = vshll.u32 %v4151_v47, 30  ;;  %3257 = vsinq.f32 %v1287_v2  ;;  %vm1710_vm15 = vcmp.eq.s32.totalorder %v1705_v37, 2  ;;  %vm1915_vm0 = vcmp.eq.s32.totalorder %v1913_v54, 0 }
 0x1c0   : > { %v4163_v62 = vsub.s32 %v1362_v28, %v1365_v58  ;;  %3259 = vcosq.f32 %v1493_v11  ;;  %vm1918_vm1 = vcmp.eq.s32.totalorder %v1913_v54, 2  ;;  %vm1706_vm2 = vcmp.lt.s32.totalorder %v1705_v37, 2 }
 0x1c1   : > { %3261 = vsinq.f32 %v1493_v11  ;;  %v4168_v59 = vsub.s32 %v1568_v10, %v1571_v27  ;;  %vm1914_vm4 = vcmp.lt.s32.totalorder %v1913_v54, 2  ;;  %v1358_v58 = vadd.s32 %v4078_v35, %v4074_v23 }
 0x1c2   : > { %v1368_v1 = vsub.s32 0, %v4163_v62  ;;  %vm1510_vm9 = vcmp.lt.s32.totalorder %v3948_v63, 0  ;;  %vm1303_vm10 = vcmp.le.f32.partialorder %v1302_v60, 0.7853982  ;;  %vm1509_vm11 = vcmp.le.f32.partialorder %v1508_v40, 0.7853982 }
 0x1c3   : > { %v1574_v24 = vsub.s32 0, %v4168_v59 }
 0x1c4   : > { %v2822_v3 = vmin.u32 %v1368_v1, %v4163_v62 }
 0x1c5   : > { %v2830_v33 = vmin.u32 %v1574_v24, %v4168_v59 }
 0x1c6   : > { %v1370_v48 = vclz %v2822_v3 }
 0x1c7   : > { %v1576_v18 = vclz %v2830_v33 }
 0x1c8   : > { %v4182_v19 = vpop.eup %3255  ;;  %v2823_v12 = vadd.s32 4294967294, %v1370_v48 }
 0x1c9   : > { %v4185_v5 = vpop.eup %3257  ;;  %v1298_v57 = vxor.u32 2147483648, %v4182_v19  ;;  %v2831_v53 = vadd.s32 4294967294, %v1576_v18 }
 0x1ca   : > { %v4188_v45 = vpop.eup %3259  ;;  %v1295_v43 = vxor.u32 2147483648, %v4185_v5  ;;  %vm2824_vm3 = vcmp.lt.s32.totalorder %v2823_v12, 0 }
 0x1cb   : > { %v4191_v16 = vpop.eup %3261  ;;  %v1504_v30 = vxor.u32 2147483648, %v4188_v45  ;;  %v1712_v56 = vsel %vm1710_vm15, %v1298_v57, %v4185_v5  ;;  %vm2832_vm6 = vcmp.lt.s32.totalorder %v2831_v53, 0  ;;  %v1373_v21 = vsel %vm2824_vm3, 0, %v2823_v12 }
 0x1cc   : > { %v1501_v6 = vxor.u32 2147483648, %v4191_v16  ;;  %v1709_v7 = vsel %vm1707_vm14, %v4182_v19, %v1295_v43  ;;  %v1579_v42 = vsel %vm2832_vm6, 0, %v2831_v53  ;;  %v1378_v44 = vsub.s32 4294967266, %v1373_v21 }
 0x1cd   : > { %v1920_v52 = vsel %vm1918_vm1, %v1504_v30, %v4191_v16  ;;  %v1713_v13 = vsel %vm1706_vm2, %v1709_v7, %v1712_v56  ;;  %v1584_v15 = vsub.s32 4294967266, %v1579_v42  ;;  %v1374_v31 = vsub.s32 32, %v1373_v21 }
 0x1ce   : > { %v1917_v46 = vsel %vm1915_vm0, %v4188_v45, %v1501_v6  ;;  %v4214_v4 = vsel %vm1291_vm5, nan, %v1713_v13  ;;  %v1379_v51 = vadd.s32 127, %v1378_v44  ;;  %v1580_v11 = vsub.s32 32, %v1579_v42 }
 0x1cf   : > { %v1921_v14 = vsel %vm1914_vm4, %v1917_v46, %v1920_v52  ;;  %v1585_v2 = vadd.s32 127, %v1584_v15  ;;  %v1376_v27 = vshrl.u32 %v1358_v58, %v1374_v31  ;;  %v1375_v32 = vshll.u32 %v4163_v62, %v1373_v21 }
 0x1d0   : > { %v4227_v10 = vsel %vm1497_vm7, nan, %v1921_v14  ;;  %v1380_v49 = vshll.u32 %v1379_v51, 23  ;;  %v1582_v24 = vshrl.u32 %v1564_v50, %v1580_v11  ;;  %v1581_v3 = vshll.u32 %v4168_v59, %v1579_v42 }
 0x1d1   : > { %v1586_v0 = vshll.u32 %v1585_v2, 23  ;;  %v1377_v9 = vor.u32 %v1376_v27, %v1375_v32  ;;  %v1388_v62 = vsub.s32 4, %v4140_v38  ;;  %v1594_v52 = vsub.s32 4, %v4151_v47 }
 0x1d2   : > { %v1381_v1 = vor.u32 4788187, %v1380_v49  ;;  %v1583_v37 = vor.u32 %v1582_v24, %v1581_v3  ;;  %v1292_v21 = vand.u32 3, %v4175_v61 }
 0x1d3   : > { %v1587_v29 = vor.u32 4788187, %v1586_v0  ;;  %v1384_v48 = vcvt.s32.f32 %v1377_v9  ;;  %v1389_v46 = vsel %vm1304_vm8, %v1388_v62, %v4140_v38  ;;  %v1595_v60 = vsel %vm1510_vm9, %v1594_v52, %v4151_v47 }
 0x1d4   : > { %v1382_v33 = vand.u32 2147483647, %v1381_v1  ;;  %v1590_v35 = vcvt.s32.f32 %v1583_v37  ;;  %v1391_v53 = vsel %vm1303_vm10, 0, %v1389_v46  ;;  %v1597_v14 = vsel %vm1509_vm11, 0, %v1595_v60 }
 0x1d5   : > { %v1588_v54 = vand.u32 2147483647, %v1587_v29  ;;  %v1808_v13 = vadd.s32 3, %v1391_v53  ;;  %v1395_v44 = vand.u32 3, %v1391_v53  ;;  %v2016_v51 = vadd.s32 3, %v1597_v14 }
 0x1d6   : > { %v1385_v23 = vmul.f32 %v1384_v48, %v1382_v33  ;;  %v1498_v38 = vand.u32 3, %v4178_v20  ;;  %vm1293_vm12 = vcmp.lt.s32.totalorder %v1292_v21, 2  ;;  %vm1294_vm13 = vcmp.eq.s32.totalorder %v1292_v21, 0 }
 0x1d7   : > { %v1591_v18 = vmul.f32 %v1590_v35, %v1588_v54  ;;  %v1809_v15 = vand.u32 3, %v1808_v13  ;;  %vm1297_vm14 = vcmp.eq.s32.totalorder %v1292_v21, 2  ;;  %vm1396_vm15 = vcmp.lt.s32.totalorder %v1395_v44, 2 }
 0x1d8   : > { %v1386_v7 = vxor.u32 2147483648, %v1385_v23  ;;  %vm1397_vm0 = vcmp.eq.s32.totalorder %v1395_v44, 0  ;;  %v1601_v49 = vand.u32 3, %v1597_v14  ;;  %vm1400_vm1 = vcmp.eq.s32.totalorder %v1395_v44, 2 }
 0x1d9   : > { %v1592_v56 = vxor.u32 2147483648, %v1591_v18  ;;  %vm1811_vm2 = vcmp.eq.s32.totalorder %v1809_v15, 0  ;;  %vm1814_vm3 = vcmp.eq.s32.totalorder %v1809_v15, 2  ;;  %v2017_v61 = vand.u32 3, %v2016_v51 }
 0x1da   : > { %v1387_v26 = vsel %vm1304_vm8, %v1386_v7, %v1385_v23  ;;  %vm1500_vm4 = vcmp.eq.s32.totalorder %v1498_v38, 0  ;;  %vm1503_vm6 = vcmp.eq.s32.totalorder %v1498_v38, 2  ;;  %v1296_v20 = vsel %vm1294_vm13, %v4182_v19, %v1295_v43 }
 0x1db   : > { %v1593_v8 = vsel %vm1510_vm9, %v1592_v56, %v1591_v18  ;;  %v1390_v59 = vsel %vm1303_vm10, %v3912_v39, %v1387_v26  ;;  %v1299_v50 = vsel %vm1297_vm14, %v1298_v57, %v4185_v5  ;;  %v1505_v9 = vsel %vm1503_vm6, %v1504_v30, %v4191_v16 }
 0x1dc   : > { %v1596_v12 = vsel %vm1509_vm11, %v3948_v63, %v1593_v8  ;;  %3263 = vcosq.f32 %v1390_v59  ;;  %vm1603_vm8 = vcmp.eq.s32.totalorder %v1601_v49, 0  ;;  %v1502_v3 = vsel %vm1500_vm4, %v4188_v45, %v1501_v6 }
 0x1dd   : > { %3265 = vsinq.f32 %v1390_v59  ;;  %vm1606_vm9 = vcmp.eq.s32.totalorder %v1601_v49, 2  ;;  %vm2019_vm10 = vcmp.eq.s32.totalorder %v2017_v61, 0  ;;  %vm2022_vm11 = vcmp.eq.s32.totalorder %v2017_v61, 2 }
 0x1de   : > { %3267 = vcosq.f32 %v1596_v12  ;;  %v1300_v57 = vsel %vm1293_vm12, %v1296_v20, %v1299_v50  ;;  %vm1810_vm13 = vcmp.lt.s32.totalorder %v1809_v15, 2  ;;  %vm1499_vm14 = vcmp.lt.s32.totalorder %v1498_v38, 2  ;;  %v3210_v20 = vld [vmem:[#allocation10 + $0x50] ss:$8 sps:$4 sm:$0xff]   ;;  %v3215_v50 = vld [vmem:[#allocation10 + $0x64] ss:$8 sps:$4 sm:$0xff]  }
 0x1df   : > { %3269 = vsinq.f32 %v1596_v12  ;;  %v1506_v30 = vsel %vm1499_vm14, %v1502_v3, %v1505_v9  ;;  %v1301_v45 = vsel %vm1291_vm5, nan, %v1300_v57  ;;  %v3219_v9 = vld [vmem:[#allocation10 + $0x80] ss:$8 sps:$4 sm:$0xff]   ;;  %v3224_v3 = vld [vmem:[#allocation10 + $0x94] ss:$8 sps:$4 sm:$0xff]  }
 0x1e0   : > { %v1507_v23 = vsel %vm1497_vm7, nan, %v1506_v30  ;;  %v3228_v57 = vld [vmem:[#allocation10 + $0xb0] ss:$8 sps:$4 sm:$0xff]   ;;  %v3236_v30 = vld [vmem:[#allocation10 + $0xd4] ss:$8 sps:$4 sm:$0xff]  }
 0x1e6   : > { %v3264_v42 = vpop.eup %3263 }
 0x1e7   : > { %v3266_v40 = vpop.eup %3265  ;;  %v1401_v58 = vxor.u32 2147483648, %v3264_v42 }
 0x1e8   : > { %v3268_v31 = vpop.eup %3267  ;;  %v1398_v47 = vxor.u32 2147483648, %v3266_v40 }
 0x1e9   : > { %v3270_v2 = vpop.eup %3269  ;;  %v1607_v27 = vxor.u32 2147483648, %v3268_v31  ;;  %v1402_v0 = vsel %vm1400_vm1, %v1401_v58, %v3266_v40  ;;  %v1816_v32 = vsel %vm1814_vm3, %v1401_v58, %v3266_v40  ;;  %vm2018_vm1 = vcmp.lt.s32.totalorder %v2017_v61, 2  ;;  %v3203_v58 = vld [vmem:[#allocation10 + $0x24] ss:$8 sps:$4 sm:$0xff]  }
 0x1ea   : > { %v1604_v11 = vxor.u32 2147483648, %v3270_v2  ;;  %v1399_v1 = vsel %vm1397_vm0, %v3264_v42, %v1398_v47  ;;  %v1813_v24 = vsel %vm1811_vm2, %v3264_v42, %v1398_v47  ;;  %vm1602_vm0 = vcmp.lt.s32.totalorder %v1601_v49, 2  ;;  %v3206_v47 = vld [vmem:[#allocation10 + $0x34] ss:$8 sps:$4 sm:$0xff]   ;;  %v3204_v49 = vld [vmem:[#allocation10 + $0x30] ss:$8 sps:$4 sm:$0xff]  }
 0x1eb   : > { %v1608_v29 = vsel %vm1606_vm9, %v1607_v27, %v3270_v2  ;;  %v2024_v5 = vsel %vm2022_vm11, %v1607_v27, %v3270_v2  ;;  %v1403_v33 = vsel %vm1396_vm15, %v1399_v1, %v1402_v0  ;;  %v1817_v37 = vsel %vm1810_vm13, %v1813_v24, %v1816_v32  ;;  %v3198_v2 = vld [vmem:[#allocation10 + $0x10] ss:$8 sps:$4 sm:$0xff]   ;;  %v3209_v61 = vld [vmem:[#allocation10 + $0x44] ss:$8 sps:$4 sm:$0xff]   ;;  %v3212_v27 = vld [vmem:[#allocation10 + $0x54] ss:$8 sps:$4 sm:$0xff]  }
 0x1ec   : > { %v1605_v43 = vsel %vm1603_vm8, %v3268_v31, %v1604_v11  ;;  %v2021_v19 = vsel %vm2019_vm10, %v3268_v31, %v1604_v11  ;;  %vm1394_vm2 = vweird.f32 %v3912_v39  ;;  %vm1600_vm3 = vweird.f32 %v3948_v63  ;;  %v3195_v31 = vld [vmem:[#allocation10] ss:$8 sps:$4 sm:$0xff]   ;;  %v3218_v32 = vld [vmem:[#allocation10 + $0x74] ss:$8 sps:$4 sm:$0xff]   ;;  %v3216_v1 = vld [vmem:[#allocation10 + $0x70] ss:$8 sps:$4 sm:$0xff]  }
 0x1ed   : > { %v1609_v16 = vsel %vm1602_vm0, %v1605_v43, %v1608_v29  ;;  %v2025_v48 = vsel %vm2018_vm1, %v2021_v19, %v2024_v5  ;;  %v1404_v6 = vsel %vm1394_vm2, nan, %v1403_v33  ;;  %v1818_v54 = vsel %vm1394_vm2, nan, %v1817_v37  ;;  %v3207_v11 = vld [vmem:[#allocation10 + $0x40] ss:$8 sps:$4 sm:$0xff]   ;;  %v3221_v24 = vld [vmem:[#allocation10 + $0x84] ss:$8 sps:$4 sm:$0xff]  }
 0x1ee   : > { %v1610_v56 = vsel %vm1600_vm3, nan, %v1609_v16  ;;  %v2026_v26 = vsel %vm1600_vm3, nan, %v2025_v48  ;;  %v3213_v0 = vld [vmem:[#allocation10 + $0x60] ss:$8 sps:$4 sm:$0xff]   ;;  %v3222_v43 = vld [vmem:[#allocation10 + $0x90] ss:$8 sps:$4 sm:$0xff]  }
 0x1ef   : > { %v3227_v29 = vld [vmem:[#allocation10 + $0xa4] ss:$8 sps:$4 sm:$0xff]   ;;  %v3225_v19 = vld [vmem:[#allocation10 + $0xa0] ss:$8 sps:$4 sm:$0xff]   ;;  %v3230_v5 = vld [vmem:[#allocation10 + $0xb4] ss:$8 sps:$4 sm:$0xff]  }
 0x1f0   : > { %v3233_v33 = vld [vmem:[#allocation10 + $0xc4] ss:$8 sps:$4 sm:$0xff]   ;;  %v3231_v37 = vld [vmem:[#allocation10 + $0xc0] ss:$8 sps:$4 sm:$0xff]   ;;  %v3234_v16 = vld [vmem:[#allocation10 + $0xd0] ss:$8 sps:$4 sm:$0xff]  }
 0x1f1   : > { %v3239_v48 = vld [vmem:[#allocation10 + $0xe4] ss:$8 sps:$4 sm:$0xff]  }
 0x213   : > { %v4210_v55 = vpop.f32.mrb[0].mxu1 }
 0x214   : > { %v4218_v28 = vmul.f32 %v4214_v4, %v4210_v55  ;;  %v4220_v17 = vpop.f32.mrb[1].mxu1  ;;  %v2027_v35 = vmul.f32 %v1301_v45, %v4210_v55 }
 0x215   : > { %v4223_v22 = vpop.f32.mrb[2].mxu1  ;;  %v2028_v18 = vmul.f32 %v1404_v6, %v4220_v17  ;;  %v2040_v8 = vmul.f32 %v1818_v54, %v4220_v17 }
 0x216   : > { %v4231_v25 = vmul.f32 %v4227_v10, %v4223_v22  ;;  %v4233_v36 = vpop.f32.mrb[3].mxu1  ;;  %v2029_v39 = vmul.f32 %v1507_v23, %v4223_v22 }
 0x217   : > { %v2030_v41 = vmul.f32 %v1610_v56, %v4233_v36  ;;  %v2042_v55 = vmul.f32 %v2026_v26, %v4233_v36 }
 0x253   : > { %v1112_v7 = vpop.f32.mrb[4].mxu1 }
 0x254   : > { %v2031_v63 = vmul.f32 %v4214_v4, %v1112_v7  ;;  %v2043_v34 = vmul.f32 %v1301_v45, %v1112_v7  ;;  %v1114_v62 = vpop.f32.mrb[5].mxu1  ;;  %v3237_v45 = vld [vmem:[#allocation10 + $0xe0] ss:$8 sps:$4 sm:$0xff]  }
 0x255   : > { %v2032_v59 = vmul.f32 %v1818_v54, %v1114_v62  ;;  %v2044_v12 = vmul.f32 %v1404_v6, %v1114_v62  ;;  %v1116_v46 = vpop.f32.mrb[6].mxu1  ;;  %v3242_v6 = vld [vmem:[#allocation10 + $0xf4] ss:$8 sps:$4 sm:$0xff]   ;;  %v3240_v54 = vld [vmem:[#allocation10 + $0xf0] ss:$8 sps:$4 sm:$0xff]  }
 0x256   : > { %v2035_v52 = vsub.f32 %v2027_v35, %v2031_v63  ;;  %v4283_v53 = vadd.f32 %v2043_v34, %v4218_v28  ;;  %v2033_v60 = vmul.f32 %v4227_v10, %v1116_v46  ;;  %v2045_v17 = vmul.f32 %v1507_v23, %v1116_v46  ;;  %v1118_v13 = vpop.f32.mrb[7].mxu1  ;;  %v3200_v10 = vld [vmem:[#allocation10 + $0x14] ss:$8 sps:$4 sm:$0xff]  }
 0x257   : > { %v2048_v22 = vadd.f32 %v2044_v12, %v2040_v8  ;;  %v2034_v14 = vmul.f32 %v2026_v26, %v1118_v13  ;;  %v2046_v4 = vmul.f32 %v1610_v56, %v1118_v13  ;;  %v2036_v21 = vsub.f32 %v2028_v18, %v2032_v59 }
 0x258   : > { %v2037_v42 = vsub.f32 %v2029_v39, %v2033_v60  ;;  %v4287_v44 = vadd.f32 %v2045_v17, %v4231_v25  ;;  %v3201_v25 = vld [vmem:[#allocation10 + $0x20] ss:$8 sps:$4 sm:$0xff]  }
 0x259   : > { %v2050_v40 = vadd.f32 %v2046_v4, %v2042_v55  ;;  %v2038_v15 = vsub.f32 %v2030_v41, %v2034_v14 }
 0x25a   : > { %v2304_v36 = vpack.c.bf16 %v4287_v44, %v4283_v53  ;;  %v2055_v51 = vpack.c.bf16 %v2037_v42, %v2035_v52 }
 0x25b   : > { %v2056_v28 = vpack.c.bf16 %v2038_v15, %v2036_v21  ;;  %v2305_v38 = vpack.c.bf16 %v2050_v40, %v2048_v22 }
 0x25d   : > { %2281 = vmatprep.mubr.bf16.mxu0 %v2056_v28 }
 0x25e   : > { %2282 = vmatmul.mubr.bf16.vlgmr.msra.gmra.mrb[0].mxu0 %v2055_v51 }
 0x25f   : > { %2499 = vmatpush1.bf16.msra.mxu0 %v3195_v31  ;;  %2530 = vmatprep.mubr.bf16.mxu0 %v2305_v38 }
 0x260   : > { %2500 = vmatprep.subr.bf16.mxu0 %v3200_v10 }
 0x263   : > { %2501 = vmatpush1.bf16.msra.mxu0 %v3198_v2 }
 0x264   : > { %2502 = vmatprep.subr.bf16.mxu0 %v3203_v58 }
 0x267   : > { %2503 = vmatpush1.bf16.msra.mxu0 %v3201_v25 }
 0x268   : > { %2504 = vmatprep.subr.bf16.mxu0 %v3206_v47 }
 0x26b   : > { %2505 = vmatpush1.bf16.msra.mxu0 %v3204_v49 }
 0x26c   : > { %2506 = vmatprep.subr.bf16.mxu0 %v3209_v61 }
 0x26f   : > { %2507 = vmatpush1.bf16.msra.mxu0 %v3207_v11 }
 0x270   : > { %2508 = vmatprep.subr.bf16.mxu0 %v3212_v27 }
 0x273   : > { %2509 = vmatpush1.bf16.msra.mxu0 %v3210_v20 }
 0x274   : > { %2510 = vmatprep.subr.bf16.mxu0 %v3215_v50 }
 0x277   : > { %2511 = vmatpush1.bf16.msra.mxu0 %v3213_v0 }
 0x278   : > { %2512 = vmatprep.subr.bf16.mxu0 %v3218_v32 }
 0x27b   : > { %2513 = vmatpush1.bf16.msra.mxu0 %v3216_v1 }
 0x27c   : > { %2514 = vmatprep.subr.bf16.mxu0 %v3221_v24 }
 0x27f   : > { %2515 = vmatpush1.bf16.msra.mxu0 %v3219_v9 }
 0x280   : > { %2516 = vmatprep.subr.bf16.mxu0 %v3224_v3 }
 0x283   : > { %2517 = vmatpush1.bf16.msra.mxu0 %v3222_v43 }
 0x284   : > { %2518 = vmatprep.subr.bf16.mxu0 %v3227_v29 }
 0x287   : > { %2519 = vmatpush1.bf16.msra.mxu0 %v3225_v19 }
 0x288   : > { %2520 = vmatprep.subr.bf16.mxu0 %v3230_v5 }
 0x28b   : > { %2521 = vmatpush1.bf16.msra.mxu0 %v3228_v57 }
 0x28c   : > { %2522 = vmatprep.subr.bf16.mxu0 %v3233_v33 }
 0x28f   : > { %2523 = vmatpush1.bf16.msra.mxu0 %v3231_v37 }
 0x290   : > { %2524 = vmatprep.subr.bf16.mxu0 %v3236_v30 }
 0x293   : > { %2525 = vmatpush1.bf16.msra.mxu0 %v3234_v16 }
 0x294   : > { %2526 = vmatprep.subr.bf16.mxu0 %v3239_v48 }
 0x297   : > { %2527 = vmatpush1.bf16.msra.mxu0 %v3237_v45 }
 0x298   : > { %2528 = vmatprep.subr.bf16.mxu0 %v3242_v6 }
 0x29b   : > { %2529 = vmatpush1.bf16.msra.mxu0 %v3240_v54 }
 0x29e   : > { %2531 = vmatmul.mubr.bf16.vlgmr.msra.gmra.mrb[0].mxu0 %v2304_v36 }
 0x371   : > { %v2532_v23 = vpop.f32.mrb[0].mxu0 }
 0x372   : > { %2556 = vst [vmem:[%s508_s29] sm:$0xff] %v2532_v23  ;;  %v2534_v35 = vpop.f32.mrb[1].mxu0 }
 0x373   : > { %2557 = vst [vmem:[%s508_s29 + $0x8] sm:$0xff] %v2534_v35  ;;  %v2536_v18 = vpop.f32.mrb[2].mxu0 }
 0x374   : > { %2558 = vst [vmem:[%s508_s29 + $0x10] sm:$0xff] %v2536_v18  ;;  %v2538_v7 = vpop.f32.mrb[3].mxu0 }
 0x375   : > { %2559 = vst [vmem:[%s508_s29 + $0x18] sm:$0xff] %v2538_v7 }
 0x376   : > { %3396 = shalt.err (!%p3393_p6)
}
 0x377   : > { %s3397_s19 = scalar_lea.hbm %s4301_s28, 512  ;;  %s3401_s13 = scalar_lea.hbm %s4392_s10, 1024 }
 0x378   : > { %p3398_p7 = scmp.ne.s32.totalorder %s4301_s28, %s3397_s19  ;;  %p3402_p4 = scmp.lt.u32.totalorder %s4301_s28, %s4392_s10 }
 0x379   : > { %p3403_p1 = scmp.lt.u32.totalorder %s3401_s13, %s3397_s19  ;;  %p3405_p8 = scmp.lt.u32.totalorder %s3397_s19, %s4301_s28 }
 0x37a   : > { %p3399_p9 = pnand %p3398_p7, %p4393_p10 }
 0x37b   : > { %p3404_p13 = por %p3403_p1, %p3402_p4 }
 0x37c   : > { %p3400_p12 = pneg %p3399_p9 }
 0x37d   : > { %p3406_p11 = por %p3405_p8, %p3404_p13 }
 0x37f   : > { %p3407_p0 = pnand %p3406_p11, %p3400_p12 }
 0x381   : > { %3410 = shalt.err (!%p3407_p0)
}
 0x382   : > { %s3489_s27 = smov 256   ;;  %s3490_s11 = smov 16  }
 0x383   : > { %2958 = dma.vmem_to_hbm [thread:$0]  (%p4393_p10), %s4296_s17, 512, %s4301_s28, %s4303_s18, %s3489_s27, %s3489_s27, %s3490_s11  }
 0x384 PF: > { %s4394_s29 = sld [smem:[#allocation20_spill]]  ;;  %s4395_s21 = sld [smem:[#allocation17_spill]] }
 0x385   : > { %s4396_s22 = sld [smem:[#allocation22_spill]] }
 0x38a   : > { %p2985_p2 = scmp.ge.s32.totalorder %s4394_s29, 2  ;;  %s2590_s7 = sand.u32 1, %s4395_s21  }
 0x38b   : > { %p4397_p3 = scmp.ne.s32.totalorder %s4396_s22, 0  ;;  %s2591_s16 = scalar_lea.sflag [#allocation6], %s2590_s7 }
 0x38d   : > { %p2974_p5 = pnand %p2985_p2, %p4397_p3 }
 0x38f   : > { %3448 = dma.done.wait (!%p2974_p5), %s2591_s16, 512  }
 0x390   : > { %3450 = vsyncadd (!%p2974_p5), %s2591_s16, 4294966784  ;;  %s26_s18 = sadd.s32 1, %s4394_s29   ;;  %s4398_s25 = sld [smem:[#allocation18_spill]] }
 0x391   : > { %p23_p6 = scmp.ge.s32.totalorder %s26_s18, 4   ;;  %s4399_s15 = sld [smem:[#allocation23_spill]] }
 0x392   : > { %s4400_s16 = sld [smem:[#allocation19_spill]]  ;;  %s4401_s17 = sld [smem:[#allocation21_spill]] }
 0x393   : > { %s4402_s13 = smov %s3457_s14  ;;  %25 = sbr.rel (!%p23_p6) target bundleno = 10 (0xa), region = 133 }
 0x396   : > { %s4403_s14 = smov %s4398_s25 }
 0x39a   :  { %2596 = vsyncpa [#allocation5], 1 }
 0x39b   :  { %2598 = vsyncpa [#allocation5 + $0x1], 1 }
 0x39c   :  { %2599 = vsyncpa [#allocation8], 1 }
 0x39d   :  { %2600 = vsyncpa [#allocation11], 1 }
 0x39e   :  { %2601 = vsyncpa [#allocation6], 1 }
 0x39f   :  { %2603 = vsyncpa [#allocation6 + $0x1], 1 }

</bundles_post_ra>
